<compile_context>
chip_gen: v5e
topology: v5e:2x2
jax: 0.10.0
libtpu: 0.0.40
codegen_flags: <defaults>
</compile_context>

<pallas_src>
import functools

import jax
import jax.numpy as jnp
import numpy as np
from jax.experimental import pallas as pl
from jax.experimental.pallas import tpu as pltpu

NEG_SLOPE = 0.01  # nn.LeakyReLU default


def _leaky(v):
    return jnp.where(v >= 0.0, v, NEG_SLOPE * v)


def _round_up(x, m):
    return (x + m - 1) // m * m


def _dense_block_kernel(x_ref, w1_ref, w2_ref, w3_ref, b_ref, mask_ref,
                        o_ref, padA, padB, patches, *, H, W, Cp):
    """Fused DenseBlock forward for one batch element.

    x_ref    : (1, Cp, Lbuf)  zero-padded, flattened NCHW image (compute dtype)
    w1_ref   : (Cp,  9*Cp)    conv1 weights, columns ordered (kh, kw, cin)
    w2_ref   : (Cp, 18*Cp)    conv2 weights, [x | out] column blocks
    w3_ref   : (Cp, 27*Cp)    conv3 weights, [x | out | out1] column blocks
    b_ref    : (3, Cp, 1)     biases (f32)
    mask_ref : (1, Lc)        1.0 at valid pixels of the flat output window
    o_ref    : (1, Cp, Lc)    output window (host strips wrap cols / pad chans)
    padA/padB: (Cp, Lbuf)     VMEM scratch: zero-haloed `out` / `out1`
    patches  : (27*Cp, Lc)    VMEM scratch: K-concatenated patch matrix
    """
    Wp = W + 2
    Lc = H * Wp
    base = Wp + 1                      # flat offset of valid pixel (0, 0)
    Lbuf = x_ref.shape[-1]
    cdt = patches.dtype
    f32 = jnp.float32

    mask = mask_ref[...]               # (1, Lc) f32

    def make_patches(load_tap, row0):
        # patches[row0 + k*Cp:(k+1)*Cp, :] = src shifted by (kh-1, kw-1).
        for kh in range(3):
            for kw in range(3):
                k = kh * 3 + kw
                s = base + (kh - 1) * Wp + (kw - 1)        # static, >= 0
                patches[row0 + k * Cp: row0 + (k + 1) * Cp, :] = load_tap(s)

    def store_padded(dst, val):
        # Interior is fully overwritten; only the halo needs zeroing.
        dst[:, 0:base] = jnp.zeros((Cp, base), cdt)
        dst[:, base + Lc:Lbuf] = jnp.zeros((Cp, Lbuf - base - Lc), cdt)
        dst[:, base:base + Lc] = val.astype(cdt)

    # ---- conv1(x) ----------------------------------------------------------
    make_patches(lambda s: x_ref[0, :, s:s + Lc], 0)
    y = jnp.dot(w1_ref[...], patches[0:9 * Cp, :], preferred_element_type=f32)
    store_padded(padA, _leaky(y + b_ref[0]) * mask)

    # ---- conv2([x, out]) : one matmul over the first 18*Cp patch rows ------
    make_patches(lambda s: padA[:, s:s + Lc], 9 * Cp)
    y = jnp.dot(w2_ref[...], patches[0:18 * Cp, :], preferred_element_type=f32)
    store_padded(padB, _leaky(y + b_ref[1]) * mask)

    # ---- conv3([x, out, out1]) + residual sum ------------------------------
    make_patches(lambda s: padB[:, s:s + Lc], 18 * Cp)
    y = jnp.dot(w3_ref[...], patches[...], preferred_element_type=f32)
    out2 = _leaky(y + b_ref[2])

    res = (out2
           + padA[:, base:base + Lc].astype(f32)          # out
           + padB[:, base:base + Lc].astype(f32)          # out1
           + x_ref[0, :, base:base + Lc].astype(f32))     # identity
    o_ref[0] = res.astype(o_ref.dtype)


def _flatten_weight(w):
    """(Cout, Cin, 3, 3) -> (Cout, 9*Cin), columns ordered (kh, kw, cin)."""
    co, ci = w.shape[0], w.shape[1]
    return jnp.transpose(w, (0, 2, 3, 1)).reshape(co, 9 * ci)


def _pad_weight(w, Cp):
    co, ci = w.shape[0], w.shape[1]
    return jnp.pad(w, ((0, Cp - co), (0, Cp - ci), (0, 0), (0, 0)))


def _pack_params(params, C, Cp, cdt):
    def flat(w):
        return _flatten_weight(_pad_weight(w, Cp))

    w1 = flat(params["w1"]).astype(cdt)                                  # (Cp, 9Cp)
    w2 = jnp.concatenate([flat(params["w2"][:, :C]),
                          flat(params["w2"][:, C:])], axis=1).astype(cdt)  # (Cp, 18Cp)
    w3 = jnp.concatenate([flat(params["w3"][:, :C]),
                          flat(params["w3"][:, C:2 * C]),
                          flat(params["w3"][:, 2 * C:])], axis=1).astype(cdt)  # (Cp, 27Cp)

    def bpad(b):
        return jnp.pad(b, (0, Cp - b.shape[0]))

    b_all = jnp.stack([bpad(params["b1"]), bpad(params["b2"]),
                       bpad(params["b3"])], axis=0).reshape(3, Cp, 1)
    return w1, w2, w3, b_all.astype(jnp.float32)


def dense_block(x, params, *, compute_dtype=jnp.bfloat16):
    """Pallas DenseBlock forward. x: (N, C, H, W) NCHW, in_ch == out_ch == C."""
    N, C, H, W = x.shape
    cdt = np.dtype(compute_dtype)
    sub = 16 if cdt.itemsize == 2 else 8        # sublane multiple per dtype
    Cp = _round_up(C, sub)
    Hp, Wp = H + 2, W + 2
    Lc = H * Wp
    Lbuf = _round_up(Hp * Wp + 2, 128)

    # Pad channels + spatial once, flatten; cast MXU operand to compute dtype.
    xp = jnp.pad(x, ((0, 0), (0, Cp - C), (1, 1), (1, 1)))
    x_buf = jnp.pad(xp.reshape(N, Cp, Hp * Wp),
                    ((0, 0), (0, 0), (0, Lbuf - Hp * Wp))).astype(cdt)

    w1, w2, w3, b_all = _pack_params(params, C, Cp, cdt)
    # A flat output position is a real pixel iff its column (mod Wp) < W.
    mask = (jnp.arange(Lc, dtype=jnp.int32) % Wp < W
            ).astype(jnp.float32).reshape(1, Lc)

    # VMEM budget: 75% of physical per-core VMEM (v5e/v6e: ~96 MiB,
    # v7x: ~48 MiB) — never request the full capacity.
    try:
        vmem_cap = int(pltpu.get_tpu_info().vmem_capacity_bytes)
    except Exception:
        vmem_cap = 64 * 1024 * 1024
    vmem_limit = max(32 << 20, min(vmem_cap * 3 // 4, 100 << 20))

    kernel = functools.partial(_dense_block_kernel, H=H, W=W, Cp=Cp)
    flops = 2 * N * H * W * (9 + 18 + 27) * Cp * Cp
    bytes_accessed = (x_buf.size * cdt.itemsize
                      + (w1.size + w2.size + w3.size) * cdt.itemsize
                      + b_all.size * 4 + mask.size * 4
                      + N * Cp * Lc * x.dtype.itemsize)

    out_win = pl.pallas_call(
        kernel,
        out_shape=jax.ShapeDtypeStruct((N, Cp, Lc), x.dtype),
        grid=(N,),
        in_specs=[
            pl.BlockSpec((1, Cp, Lbuf), lambda n: (n, 0, 0)),
            pl.BlockSpec((Cp, 9 * Cp), lambda n: (0, 0)),
            pl.BlockSpec((Cp, 18 * Cp), lambda n: (0, 0)),
            pl.BlockSpec((Cp, 27 * Cp), lambda n: (0, 0)),
            pl.BlockSpec((3, Cp, 1), lambda n: (0, 0, 0)),
            pl.BlockSpec((1, Lc), lambda n: (0, 0)),
        ],
        out_specs=pl.BlockSpec((1, Cp, Lc), lambda n: (n, 0, 0)),
        scratch_shapes=[
            pltpu.VMEM((Cp, Lbuf), cdt),        # zero-haloed out
            pltpu.VMEM((Cp, Lbuf), cdt),        # zero-haloed out1
            pltpu.VMEM((27 * Cp, Lc), cdt),     # K-concatenated patch matrix
        ],
        compiler_params=pltpu.CompilerParams(
            dimension_semantics=("parallel",),
            vmem_limit_bytes=vmem_limit,
        ),
        cost_estimate=pl.CostEstimate(
            flops=flops, transcendentals=0, bytes_accessed=bytes_accessed),
    )(x_buf, w1, w2, w3, b_all, mask)

    # (N, Cp, H*Wp) -> (N, C, H, W): drop padded channels and wrap columns.
    return out_win.reshape(N, Cp, H, Wp)[:, :C, :, :W]


def dense_block_ref(x, params):
    """Pure-JAX NCHW reference mirroring the PyTorch forward."""
    def conv(inp, w, b):
        y = jax.lax.conv_general_dilated(
            inp, w, window_strides=(1, 1), padding="SAME",
            dimension_numbers=("NCHW", "OIHW", "NCHW"))
        return y + b.reshape(1, -1, 1, 1)

    out = _leaky(conv(x, params["w1"], params["b1"]))
    out1 = _leaky(conv(jnp.concatenate([x, out], 1), params["w2"], params["b2"]))
    out2 = _leaky(conv(jnp.concatenate([x, out, out1], 1),
                       params["w3"], params["b3"]))
    return out + out1 + out2 + x


def init_params(key, in_ch, out_ch):
    ks = jax.random.split(key, 6)

    def w(k, cin, cout):
        # PyTorch layout (Cout, Cin, 3, 3), roughly kaiming-scaled.
        return (jax.random.normal(k, (cout, cin, 3, 3), jnp.float32)
                * (1.0 / jnp.sqrt(9.0 * cin)))

    def b(k, cout):
        return jax.random.normal(k, (cout,), jnp.float32) * 0.01

    return {
        "w1": w(ks[0], in_ch, out_ch),      "b1": b(ks[1], out_ch),
        "w2": w(ks[2], 2 * out_ch, out_ch), "b2": b(ks[3], out_ch),
        "w3": w(ks[4], 3 * out_ch, out_ch), "b3": b(ks[5], out_ch),
    }


if __name__ == "__main__":
    # Residual add (out + out1 + out2 + identity) requires in_ch == out_ch.
    N, C, H, W = 2, 4, 16, 16
    key = jax.random.PRNGKey(0)
    kx, kp = jax.random.split(key)
    x = jax.random.normal(kx, (N, C, H, W), jnp.float32)
    params = init_params(kp, C, C)

    y_ref = dense_block_ref(x, params)

    # f32 MXU operands: tight reference check.
    y32 = jax.jit(functools.partial(dense_block, compute_dtype=jnp.float32))(
        x, params)
    y32 = jax.block_until_ready(y32)
    assert y32.shape == (N, C, H, W)
    err32 = float(jnp.max(jnp.abs(y32 - y_ref)))
    assert jnp.allclose(y32, y_ref, atol=1e-4, rtol=1e-4), err32

    # bf16 MXU operands (production path): operand rounding costs ~1e-2 abs.
    ybf = jax.jit(functools.partial(dense_block, compute_dtype=jnp.bfloat16))(
        x, params)
    ybf = jax.block_until_ready(ybf)
    errbf = float(jnp.max(jnp.abs(ybf - y_ref)))
    assert jnp.allclose(ybf, y_ref, atol=1e-1, rtol=1e-1), errbf

    print("KERNEL_OK")
</pallas_src>

<mosaic_0001>
module attributes {stable_mosaic.version = 11 : i64} {
  func.func @_dense_block_kernel(%arg0: i32, %arg1: memref<1x8x384xf32, #tpu.memory_space<vmem>>, %arg2: memref<8x72xf32, #tpu.memory_space<vmem>>, %arg3: memref<8x144xf32, #tpu.memory_space<vmem>>, %arg4: memref<8x216xf32, #tpu.memory_space<vmem>>, %arg5: memref<3x8x1xf32, #tpu.memory_space<vmem>>, %arg6: memref<1x288xf32, #tpu.memory_space<vmem>>, %arg7: memref<1x8x288xf32, #tpu.memory_space<vmem>>, %arg8: memref<8x384xf32, #tpu.memory_space<vmem>>, %arg9: memref<8x384xf32, #tpu.memory_space<vmem>>, %arg10: memref<216x288xf32, #tpu.memory_space<vmem>>) attributes {dimension_semantics = [#tpu.dimension_semantics<parallel>], iteration_bounds = array<i64: 2>, scalar_prefetch = 0 : i64, scratch_operands = 3 : i64, tpu.core_type = #tpu.core_type<tc>, window_params = [{transform_indices = @transform_0, window_bounds = array<i64: 1, 8, 384>}, {pipeline_mode = #tpu.pipeline_mode<synchronous>, transform_indices = @transform_1, window_bounds = array<i64: 8, 72>}, {pipeline_mode = #tpu.pipeline_mode<synchronous>, transform_indices = @transform_2, window_bounds = array<i64: 8, 144>}, {pipeline_mode = #tpu.pipeline_mode<synchronous>, transform_indices = @transform_3, window_bounds = array<i64: 8, 216>}, {pipeline_mode = #tpu.pipeline_mode<synchronous>, transform_indices = @transform_4, window_bounds = array<i64: 3, 8, 1>}, {pipeline_mode = #tpu.pipeline_mode<synchronous>, transform_indices = @transform_5, window_bounds = array<i64: 1, 288>}, {transform_indices = @transform_6, window_bounds = array<i64: 1, 8, 288>}]} {
    %c0 = arith.constant 0 : index
    %c0_0 = arith.constant 0 : index
    %0 = vector.load %arg6[%c0, %c0_0] : memref<1x288xf32, #tpu.memory_space<vmem>>, vector<1x288xf32>
    %c0_1 = arith.constant 0 : index
    %c0_2 = arith.constant 0 : index
    %c0_3 = arith.constant 0 : index
    %1 = vector.load %arg1[%c0_1, %c0_2, %c0_3] : memref<1x8x384xf32, #tpu.memory_space<vmem>>, vector<1x8x288xf32>
    %2 = vector.shape_cast %1 : vector<1x8x288xf32> to vector<8x288xf32>
    %c0_4 = arith.constant 0 : index
    %c0_5 = arith.constant 0 : index
    %3 = vector.load %arg10[%c0_4, %c0_5] : memref<216x288xf32, #tpu.memory_space<vmem>>, vector<8x288xf32>
    tpu.vector_store %arg10[%c0_4, %c0_5], %2 {strides = array<i32>} : memref<216x288xf32, #tpu.memory_space<vmem>>, vector<8x288xf32>,
    %c0_6 = arith.constant 0 : index
    %c0_7 = arith.constant 0 : index
    %c1 = arith.constant 1 : index
    %4 = vector.load %arg1[%c0_6, %c0_7, %c1] : memref<1x8x384xf32, #tpu.memory_space<vmem>>, vector<1x8x288xf32>
    %5 = vector.shape_cast %4 : vector<1x8x288xf32> to vector<8x288xf32>
    %c8 = arith.constant 8 : index
    %c0_8 = arith.constant 0 : index
    %6 = vector.load %arg10[%c8, %c0_8] : memref<216x288xf32, #tpu.memory_space<vmem>>, vector<8x288xf32>
    tpu.vector_store %arg10[%c8, %c0_8], %5 {strides = array<i32>} : memref<216x288xf32, #tpu.memory_space<vmem>>, vector<8x288xf32>,
    %c0_9 = arith.constant 0 : index
    %c0_10 = arith.constant 0 : index
    %c2 = arith.constant 2 : index
    %7 = vector.load %arg1[%c0_9, %c0_10, %c2] : memref<1x8x384xf32, #tpu.memory_space<vmem>>, vector<1x8x288xf32>
    %8 = vector.shape_cast %7 : vector<1x8x288xf32> to vector<8x288xf32>
    %c16 = arith.constant 16 : index
    %c0_11 = arith.constant 0 : index
    %9 = vector.load %arg10[%c16, %c0_11] : memref<216x288xf32, #tpu.memory_space<vmem>>, vector<8x288xf32>
    tpu.vector_store %arg10[%c16, %c0_11], %8 {strides = array<i32>} : memref<216x288xf32, #tpu.memory_space<vmem>>, vector<8x288xf32>,
    %c0_12 = arith.constant 0 : index
    %c0_13 = arith.constant 0 : index
    %c18 = arith.constant 18 : index
    %10 = vector.load %arg1[%c0_12, %c0_13, %c18] : memref<1x8x384xf32, #tpu.memory_space<vmem>>, vector<1x8x288xf32>
    %11 = vector.shape_cast %10 : vector<1x8x288xf32> to vector<8x288xf32>
    %c24 = arith.constant 24 : index
    %c0_14 = arith.constant 0 : index
    %12 = vector.load %arg10[%c24, %c0_14] : memref<216x288xf32, #tpu.memory_space<vmem>>, vector<8x288xf32>
    tpu.vector_store %arg10[%c24, %c0_14], %11 {strides = array<i32>} : memref<216x288xf32, #tpu.memory_space<vmem>>, vector<8x288xf32>,
    %c0_15 = arith.constant 0 : index
    %c0_16 = arith.constant 0 : index
    %c19 = arith.constant 19 : index
    %13 = vector.load %arg1[%c0_15, %c0_16, %c19] : memref<1x8x384xf32, #tpu.memory_space<vmem>>, vector<1x8x288xf32>
    %14 = vector.shape_cast %13 : vector<1x8x288xf32> to vector<8x288xf32>
    %c32 = arith.constant 32 : index
    %c0_17 = arith.constant 0 : index
    %15 = vector.load %arg10[%c32, %c0_17] : memref<216x288xf32, #tpu.memory_space<vmem>>, vector<8x288xf32>
    tpu.vector_store %arg10[%c32, %c0_17], %14 {strides = array<i32>} : memref<216x288xf32, #tpu.memory_space<vmem>>, vector<8x288xf32>,
    %c0_18 = arith.constant 0 : index
    %c0_19 = arith.constant 0 : index
    %c20 = arith.constant 20 : index
    %16 = vector.load %arg1[%c0_18, %c0_19, %c20] : memref<1x8x384xf32, #tpu.memory_space<vmem>>, vector<1x8x288xf32>
    %17 = vector.shape_cast %16 : vector<1x8x288xf32> to vector<8x288xf32>
    %c40 = arith.constant 40 : index
    %c0_20 = arith.constant 0 : index
    %18 = vector.load %arg10[%c40, %c0_20] : memref<216x288xf32, #tpu.memory_space<vmem>>, vector<8x288xf32>
    tpu.vector_store %arg10[%c40, %c0_20], %17 {strides = array<i32>} : memref<216x288xf32, #tpu.memory_space<vmem>>, vector<8x288xf32>,
    %c0_21 = arith.constant 0 : index
    %c0_22 = arith.constant 0 : index
    %c36 = arith.constant 36 : index
    %19 = vector.load %arg1[%c0_21, %c0_22, %c36] : memref<1x8x384xf32, #tpu.memory_space<vmem>>, vector<1x8x288xf32>
    %20 = vector.shape_cast %19 : vector<1x8x288xf32> to vector<8x288xf32>
    %c48 = arith.constant 48 : index
    %c0_23 = arith.constant 0 : index
    %21 = vector.load %arg10[%c48, %c0_23] : memref<216x288xf32, #tpu.memory_space<vmem>>, vector<8x288xf32>
    tpu.vector_store %arg10[%c48, %c0_23], %20 {strides = array<i32>} : memref<216x288xf32, #tpu.memory_space<vmem>>, vector<8x288xf32>,
    %c0_24 = arith.constant 0 : index
    %c0_25 = arith.constant 0 : index
    %c37 = arith.constant 37 : index
    %22 = vector.load %arg1[%c0_24, %c0_25, %c37] : memref<1x8x384xf32, #tpu.memory_space<vmem>>, vector<1x8x288xf32>
    %23 = vector.shape_cast %22 : vector<1x8x288xf32> to vector<8x288xf32>
    %c56 = arith.constant 56 : index
    %c0_26 = arith.constant 0 : index
    %24 = vector.load %arg10[%c56, %c0_26] : memref<216x288xf32, #tpu.memory_space<vmem>>, vector<8x288xf32>
    tpu.vector_store %arg10[%c56, %c0_26], %23 {strides = array<i32>} : memref<216x288xf32, #tpu.memory_space<vmem>>, vector<8x288xf32>,
    %c0_27 = arith.constant 0 : index
    %c0_28 = arith.constant 0 : index
    %c38 = arith.constant 38 : index
    %25 = vector.load %arg1[%c0_27, %c0_28, %c38] : memref<1x8x384xf32, #tpu.memory_space<vmem>>, vector<1x8x288xf32>
    %26 = vector.shape_cast %25 : vector<1x8x288xf32> to vector<8x288xf32>
    %c64 = arith.constant 64 : index
    %c0_29 = arith.constant 0 : index
    %27 = vector.load %arg10[%c64, %c0_29] : memref<216x288xf32, #tpu.memory_space<vmem>>, vector<8x288xf32>
    tpu.vector_store %arg10[%c64, %c0_29], %26 {strides = array<i32>} : memref<216x288xf32, #tpu.memory_space<vmem>>, vector<8x288xf32>,
    %c0_30 = arith.constant 0 : index
    %c0_31 = arith.constant 0 : index
    %28 = vector.load %arg2[%c0_30, %c0_31] : memref<8x72xf32, #tpu.memory_space<vmem>>, vector<8x72xf32>
    %c0_32 = arith.constant 0 : index
    %c0_33 = arith.constant 0 : index
    %29 = vector.load %arg10[%c0_32, %c0_33] : memref<216x288xf32, #tpu.memory_space<vmem>>, vector<72x288xf32>
    %cst = arith.constant dense<0.000000e+00> : vector<8x288xf32>
    %30 = tpu.matmul %28, %29, %cst {dimension_numbers = #tpu.dot_dimension_numbers<[1], [0], [0], [1], [0, 0, 1, 1], [], []>} : vector<8x72xf32>, vector<72x288xf32>, vector<8x288xf32> -> vector<8x288xf32>
    %c0_34 = arith.constant 0 : index
    %c0_35 = arith.constant 0 : index
    %c0_36 = arith.constant 0 : index
    %31 = vector.load %arg5[%c0_34, %c0_35, %c0_36] : memref<3x8x1xf32, #tpu.memory_space<vmem>>, vector<1x8x1xf32>
    %32 = vector.shape_cast %31 : vector<1x8x1xf32> to vector<8x1xf32>
    %33 = vector.broadcast %32 : vector<8x1xf32> to vector<8x288xf32>
    %34 = arith.addf %30, %33 : vector<8x288xf32>
    %cst_37 = arith.constant 0.000000e+00 : f32
    %35 = vector.broadcast %cst_37 : f32 to vector<8x288xf32>
    %36 = arith.cmpf oge, %34, %35 : vector<8x288xf32>
    %cst_38 = arith.constant 0.00999999977 : f32
    %37 = vector.broadcast %cst_38 : f32 to vector<8x288xf32>
    %38 = arith.mulf %37, %34 : vector<8x288xf32>
    %39 = arith.select %36, %34, %38 : vector<8x288xi1>, vector<8x288xf32>
    %40 = vector.broadcast %0 : vector<1x288xf32> to vector<8x288xf32>
    %41 = arith.mulf %39, %40 : vector<8x288xf32>
    %cst_39 = arith.constant 0.000000e+00 : f32
    %42 = vector.broadcast %cst_39 : f32 to vector<8x19xf32>
    %c0_40 = arith.constant 0 : index
    %c0_41 = arith.constant 0 : index
    %43 = vector.load %arg8[%c0_40, %c0_41] : memref<8x384xf32, #tpu.memory_space<vmem>>, vector<8x19xf32>
    tpu.vector_store %arg8[%c0_40, %c0_41], %42 {strides = array<i32>} : memref<8x384xf32, #tpu.memory_space<vmem>>, vector<8x19xf32>,
    %cst_42 = arith.constant 0.000000e+00 : f32
    %44 = vector.broadcast %cst_42 : f32 to vector<8x77xf32>
    %c0_43 = arith.constant 0 : index
    %c307 = arith.constant 307 : index
    %45 = vector.load %arg8[%c0_43, %c307] : memref<8x384xf32, #tpu.memory_space<vmem>>, vector<8x77xf32>
    tpu.vector_store %arg8[%c0_43, %c307], %44 {strides = array<i32>} : memref<8x384xf32, #tpu.memory_space<vmem>>, vector<8x77xf32>,
    %c0_44 = arith.constant 0 : index
    %c19_45 = arith.constant 19 : index
    %46 = vector.load %arg8[%c0_44, %c19_45] : memref<8x384xf32, #tpu.memory_space<vmem>>, vector<8x288xf32>
    tpu.vector_store %arg8[%c0_44, %c19_45], %41 {strides = array<i32>} : memref<8x384xf32, #tpu.memory_space<vmem>>, vector<8x288xf32>,
    %c0_46 = arith.constant 0 : index
    %c0_47 = arith.constant 0 : index
    %47 = vector.load %arg8[%c0_46, %c0_47] : memref<8x384xf32, #tpu.memory_space<vmem>>, vector<8x288xf32>
    %c72 = arith.constant 72 : index
    %c0_48 = arith.constant 0 : index
    %48 = vector.load %arg10[%c72, %c0_48] : memref<216x288xf32, #tpu.memory_space<vmem>>, vector<8x288xf32>
    tpu.vector_store %arg10[%c72, %c0_48], %47 {strides = array<i32>} : memref<216x288xf32, #tpu.memory_space<vmem>>, vector<8x288xf32>,
    %c0_49 = arith.constant 0 : index
    %c1_50 = arith.constant 1 : index
    %49 = vector.load %arg8[%c0_49, %c1_50] : memref<8x384xf32, #tpu.memory_space<vmem>>, vector<8x288xf32>
    %c80 = arith.constant 80 : index
    %c0_51 = arith.constant 0 : index
    %50 = vector.load %arg10[%c80, %c0_51] : memref<216x288xf32, #tpu.memory_space<vmem>>, vector<8x288xf32>
    tpu.vector_store %arg10[%c80, %c0_51], %49 {strides = array<i32>} : memref<216x288xf32, #tpu.memory_space<vmem>>, vector<8x288xf32>,
    %c0_52 = arith.constant 0 : index
    %c2_53 = arith.constant 2 : index
    %51 = vector.load %arg8[%c0_52, %c2_53] : memref<8x384xf32, #tpu.memory_space<vmem>>, vector<8x288xf32>
    %c88 = arith.constant 88 : index
    %c0_54 = arith.constant 0 : index
    %52 = vector.load %arg10[%c88, %c0_54] : memref<216x288xf32, #tpu.memory_space<vmem>>, vector<8x288xf32>
    tpu.vector_store %arg10[%c88, %c0_54], %51 {strides = array<i32>} : memref<216x288xf32, #tpu.memory_space<vmem>>, vector<8x288xf32>,
    %c0_55 = arith.constant 0 : index
    %c18_56 = arith.constant 18 : index
    %53 = vector.load %arg8[%c0_55, %c18_56] : memref<8x384xf32, #tpu.memory_space<vmem>>, vector<8x288xf32>
    %c96 = arith.constant 96 : index
    %c0_57 = arith.constant 0 : index
    %54 = vector.load %arg10[%c96, %c0_57] : memref<216x288xf32, #tpu.memory_space<vmem>>, vector<8x288xf32>
    tpu.vector_store %arg10[%c96, %c0_57], %53 {strides = array<i32>} : memref<216x288xf32, #tpu.memory_space<vmem>>, vector<8x288xf32>,
    %c0_58 = arith.constant 0 : index
    %c19_59 = arith.constant 19 : index
    %55 = vector.load %arg8[%c0_58, %c19_59] : memref<8x384xf32, #tpu.memory_space<vmem>>, vector<8x288xf32>
    %c104 = arith.constant 104 : index
    %c0_60 = arith.constant 0 : index
    %56 = vector.load %arg10[%c104, %c0_60] : memref<216x288xf32, #tpu.memory_space<vmem>>, vector<8x288xf32>
    tpu.vector_store %arg10[%c104, %c0_60], %55 {strides = array<i32>} : memref<216x288xf32, #tpu.memory_space<vmem>>, vector<8x288xf32>,
    %c0_61 = arith.constant 0 : index
    %c20_62 = arith.constant 20 : index
    %57 = vector.load %arg8[%c0_61, %c20_62] : memref<8x384xf32, #tpu.memory_space<vmem>>, vector<8x288xf32>
    %c112 = arith.constant 112 : index
    %c0_63 = arith.constant 0 : index
    %58 = vector.load %arg10[%c112, %c0_63] : memref<216x288xf32, #tpu.memory_space<vmem>>, vector<8x288xf32>
    tpu.vector_store %arg10[%c112, %c0_63], %57 {strides = array<i32>} : memref<216x288xf32, #tpu.memory_space<vmem>>, vector<8x288xf32>,
    %c0_64 = arith.constant 0 : index
    %c36_65 = arith.constant 36 : index
    %59 = vector.load %arg8[%c0_64, %c36_65] : memref<8x384xf32, #tpu.memory_space<vmem>>, vector<8x288xf32>
    %c120 = arith.constant 120 : index
    %c0_66 = arith.constant 0 : index
    %60 = vector.load %arg10[%c120, %c0_66] : memref<216x288xf32, #tpu.memory_space<vmem>>, vector<8x288xf32>
    tpu.vector_store %arg10[%c120, %c0_66], %59 {strides = array<i32>} : memref<216x288xf32, #tpu.memory_space<vmem>>, vector<8x288xf32>,
    %c0_67 = arith.constant 0 : index
    %c37_68 = arith.constant 37 : index
    %61 = vector.load %arg8[%c0_67, %c37_68] : memref<8x384xf32, #tpu.memory_space<vmem>>, vector<8x288xf32>
    %c128 = arith.constant 128 : index
    %c0_69 = arith.constant 0 : index
    %62 = vector.load %arg10[%c128, %c0_69] : memref<216x288xf32, #tpu.memory_space<vmem>>, vector<8x288xf32>
    tpu.vector_store %arg10[%c128, %c0_69], %61 {strides = array<i32>} : memref<216x288xf32, #tpu.memory_space<vmem>>, vector<8x288xf32>,
    %c0_70 = arith.constant 0 : index
    %c38_71 = arith.constant 38 : index
    %63 = vector.load %arg8[%c0_70, %c38_71] : memref<8x384xf32, #tpu.memory_space<vmem>>, vector<8x288xf32>
    %c136 = arith.constant 136 : index
    %c0_72 = arith.constant 0 : index
    %64 = vector.load %arg10[%c136, %c0_72] : memref<216x288xf32, #tpu.memory_space<vmem>>, vector<8x288xf32>
    tpu.vector_store %arg10[%c136, %c0_72], %63 {strides = array<i32>} : memref<216x288xf32, #tpu.memory_space<vmem>>, vector<8x288xf32>,
    %c0_73 = arith.constant 0 : index
    %c0_74 = arith.constant 0 : index
    %65 = vector.load %arg3[%c0_73, %c0_74] : memref<8x144xf32, #tpu.memory_space<vmem>>, vector<8x144xf32>
    %c0_75 = arith.constant 0 : index
    %c0_76 = arith.constant 0 : index
    %66 = vector.load %arg10[%c0_75, %c0_76] : memref<216x288xf32, #tpu.memory_space<vmem>>, vector<144x288xf32>
    %cst_77 = arith.constant dense<0.000000e+00> : vector<8x288xf32>
    %67 = tpu.matmul %65, %66, %cst_77 {dimension_numbers = #tpu.dot_dimension_numbers<[1], [0], [0], [1], [0, 0, 1, 1], [], []>} : vector<8x144xf32>, vector<144x288xf32>, vector<8x288xf32> -> vector<8x288xf32>
    %c1_78 = arith.constant 1 : index
    %c0_79 = arith.constant 0 : index
    %c0_80 = arith.constant 0 : index
    %68 = vector.load %arg5[%c1_78, %c0_79, %c0_80] : memref<3x8x1xf32, #tpu.memory_space<vmem>>, vector<1x8x1xf32>
    %69 = vector.shape_cast %68 : vector<1x8x1xf32> to vector<8x1xf32>
    %70 = vector.broadcast %69 : vector<8x1xf32> to vector<8x288xf32>
    %71 = arith.addf %67, %70 : vector<8x288xf32>
    %cst_81 = arith.constant 0.000000e+00 : f32
    %72 = vector.broadcast %cst_81 : f32 to vector<8x288xf32>
    %73 = arith.cmpf oge, %71, %72 : vector<8x288xf32>
    %cst_82 = arith.constant 0.00999999977 : f32
    %74 = vector.broadcast %cst_82 : f32 to vector<8x288xf32>
    %75 = arith.mulf %74, %71 : vector<8x288xf32>
    %76 = arith.select %73, %71, %75 : vector<8x288xi1>, vector<8x288xf32>
    %77 = vector.broadcast %0 : vector<1x288xf32> to vector<8x288xf32>
    %78 = arith.mulf %76, %77 : vector<8x288xf32>
    %cst_83 = arith.constant 0.000000e+00 : f32
    %79 = vector.broadcast %cst_83 : f32 to vector<8x19xf32>
    %c0_84 = arith.constant 0 : index
    %c0_85 = arith.constant 0 : index
    %80 = vector.load %arg9[%c0_84, %c0_85] : memref<8x384xf32, #tpu.memory_space<vmem>>, vector<8x19xf32>
    tpu.vector_store %arg9[%c0_84, %c0_85], %79 {strides = array<i32>} : memref<8x384xf32, #tpu.memory_space<vmem>>, vector<8x19xf32>,
    %cst_86 = arith.constant 0.000000e+00 : f32
    %81 = vector.broadcast %cst_86 : f32 to vector<8x77xf32>
    %c0_87 = arith.constant 0 : index
    %c307_88 = arith.constant 307 : index
    %82 = vector.load %arg9[%c0_87, %c307_88] : memref<8x384xf32, #tpu.memory_space<vmem>>, vector<8x77xf32>
    tpu.vector_store %arg9[%c0_87, %c307_88], %81 {strides = array<i32>} : memref<8x384xf32, #tpu.memory_space<vmem>>, vector<8x77xf32>,
    %c0_89 = arith.constant 0 : index
    %c19_90 = arith.constant 19 : index
    %83 = vector.load %arg9[%c0_89, %c19_90] : memref<8x384xf32, #tpu.memory_space<vmem>>, vector<8x288xf32>
    tpu.vector_store %arg9[%c0_89, %c19_90], %78 {strides = array<i32>} : memref<8x384xf32, #tpu.memory_space<vmem>>, vector<8x288xf32>,
    %c0_91 = arith.constant 0 : index
    %c0_92 = arith.constant 0 : index
    %84 = vector.load %arg9[%c0_91, %c0_92] : memref<8x384xf32, #tpu.memory_space<vmem>>, vector<8x288xf32>
    %c144 = arith.constant 144 : index
    %c0_93 = arith.constant 0 : index
    %85 = vector.load %arg10[%c144, %c0_93] : memref<216x288xf32, #tpu.memory_space<vmem>>, vector<8x288xf32>
    tpu.vector_store %arg10[%c144, %c0_93], %84 {strides = array<i32>} : memref<216x288xf32, #tpu.memory_space<vmem>>, vector<8x288xf32>,
    %c0_94 = arith.constant 0 : index
    %c1_95 = arith.constant 1 : index
    %86 = vector.load %arg9[%c0_94, %c1_95] : memref<8x384xf32, #tpu.memory_space<vmem>>, vector<8x288xf32>
    %c152 = arith.constant 152 : index
    %c0_96 = arith.constant 0 : index
    %87 = vector.load %arg10[%c152, %c0_96] : memref<216x288xf32, #tpu.memory_space<vmem>>, vector<8x288xf32>
    tpu.vector_store %arg10[%c152, %c0_96], %86 {strides = array<i32>} : memref<216x288xf32, #tpu.memory_space<vmem>>, vector<8x288xf32>,
    %c0_97 = arith.constant 0 : index
    %c2_98 = arith.constant 2 : index
    %88 = vector.load %arg9[%c0_97, %c2_98] : memref<8x384xf32, #tpu.memory_space<vmem>>, vector<8x288xf32>
    %c160 = arith.constant 160 : index
    %c0_99 = arith.constant 0 : index
    %89 = vector.load %arg10[%c160, %c0_99] : memref<216x288xf32, #tpu.memory_space<vmem>>, vector<8x288xf32>
    tpu.vector_store %arg10[%c160, %c0_99], %88 {strides = array<i32>} : memref<216x288xf32, #tpu.memory_space<vmem>>, vector<8x288xf32>,
    %c0_100 = arith.constant 0 : index
    %c18_101 = arith.constant 18 : index
    %90 = vector.load %arg9[%c0_100, %c18_101] : memref<8x384xf32, #tpu.memory_space<vmem>>, vector<8x288xf32>
    %c168 = arith.constant 168 : index
    %c0_102 = arith.constant 0 : index
    %91 = vector.load %arg10[%c168, %c0_102] : memref<216x288xf32, #tpu.memory_space<vmem>>, vector<8x288xf32>
    tpu.vector_store %arg10[%c168, %c0_102], %90 {strides = array<i32>} : memref<216x288xf32, #tpu.memory_space<vmem>>, vector<8x288xf32>,
    %c0_103 = arith.constant 0 : index
    %c19_104 = arith.constant 19 : index
    %92 = vector.load %arg9[%c0_103, %c19_104] : memref<8x384xf32, #tpu.memory_space<vmem>>, vector<8x288xf32>
    %c176 = arith.constant 176 : index
    %c0_105 = arith.constant 0 : index
    %93 = vector.load %arg10[%c176, %c0_105] : memref<216x288xf32, #tpu.memory_space<vmem>>, vector<8x288xf32>
    tpu.vector_store %arg10[%c176, %c0_105], %92 {strides = array<i32>} : memref<216x288xf32, #tpu.memory_space<vmem>>, vector<8x288xf32>,
    %c0_106 = arith.constant 0 : index
    %c20_107 = arith.constant 20 : index
    %94 = vector.load %arg9[%c0_106, %c20_107] : memref<8x384xf32, #tpu.memory_space<vmem>>, vector<8x288xf32>
    %c184 = arith.constant 184 : index
    %c0_108 = arith.constant 0 : index
    %95 = vector.load %arg10[%c184, %c0_108] : memref<216x288xf32, #tpu.memory_space<vmem>>, vector<8x288xf32>
    tpu.vector_store %arg10[%c184, %c0_108], %94 {strides = array<i32>} : memref<216x288xf32, #tpu.memory_space<vmem>>, vector<8x288xf32>,
    %c0_109 = arith.constant 0 : index
    %c36_110 = arith.constant 36 : index
    %96 = vector.load %arg9[%c0_109, %c36_110] : memref<8x384xf32, #tpu.memory_space<vmem>>, vector<8x288xf32>
    %c192 = arith.constant 192 : index
    %c0_111 = arith.constant 0 : index
    %97 = vector.load %arg10[%c192, %c0_111] : memref<216x288xf32, #tpu.memory_space<vmem>>, vector<8x288xf32>
    tpu.vector_store %arg10[%c192, %c0_111], %96 {strides = array<i32>} : memref<216x288xf32, #tpu.memory_space<vmem>>, vector<8x288xf32>,
    %c0_112 = arith.constant 0 : index
    %c37_113 = arith.constant 37 : index
    %98 = vector.load %arg9[%c0_112, %c37_113] : memref<8x384xf32, #tpu.memory_space<vmem>>, vector<8x288xf32>
    %c200 = arith.constant 200 : index
    %c0_114 = arith.constant 0 : index
    %99 = vector.load %arg10[%c200, %c0_114] : memref<216x288xf32, #tpu.memory_space<vmem>>, vector<8x288xf32>
    tpu.vector_store %arg10[%c200, %c0_114], %98 {strides = array<i32>} : memref<216x288xf32, #tpu.memory_space<vmem>>, vector<8x288xf32>,
    %c0_115 = arith.constant 0 : index
    %c38_116 = arith.constant 38 : index
    %100 = vector.load %arg9[%c0_115, %c38_116] : memref<8x384xf32, #tpu.memory_space<vmem>>, vector<8x288xf32>
    %c208 = arith.constant 208 : index
    %c0_117 = arith.constant 0 : index
    %101 = vector.load %arg10[%c208, %c0_117] : memref<216x288xf32, #tpu.memory_space<vmem>>, vector<8x288xf32>
    tpu.vector_store %arg10[%c208, %c0_117], %100 {strides = array<i32>} : memref<216x288xf32, #tpu.memory_space<vmem>>, vector<8x288xf32>,
    %c0_118 = arith.constant 0 : index
    %c0_119 = arith.constant 0 : index
    %102 = vector.load %arg4[%c0_118, %c0_119] : memref<8x216xf32, #tpu.memory_space<vmem>>, vector<8x216xf32>
    %c0_120 = arith.constant 0 : index
    %c0_121 = arith.constant 0 : index
    %103 = vector.load %arg10[%c0_120, %c0_121] : memref<216x288xf32, #tpu.memory_space<vmem>>, vector<216x288xf32>
    %cst_122 = arith.constant dense<0.000000e+00> : vector<8x288xf32>
    %104 = tpu.matmul %102, %103, %cst_122 {dimension_numbers = #tpu.dot_dimension_numbers<[1], [0], [0], [1], [0, 0, 1, 1], [], []>} : vector<8x216xf32>, vector<216x288xf32>, vector<8x288xf32> -> vector<8x288xf32>
    %c2_123 = arith.constant 2 : index
    %c0_124 = arith.constant 0 : index
    %c0_125 = arith.constant 0 : index
    %105 = vector.load %arg5[%c2_123, %c0_124, %c0_125] : memref<3x8x1xf32, #tpu.memory_space<vmem>>, vector<1x8x1xf32>
    %106 = vector.shape_cast %105 : vector<1x8x1xf32> to vector<8x1xf32>
    %107 = vector.broadcast %106 : vector<8x1xf32> to vector<8x288xf32>
    %108 = arith.addf %104, %107 : vector<8x288xf32>
    %cst_126 = arith.constant 0.000000e+00 : f32
    %109 = vector.broadcast %cst_126 : f32 to vector<8x288xf32>
    %110 = arith.cmpf oge, %108, %109 : vector<8x288xf32>
    %cst_127 = arith.constant 0.00999999977 : f32
    %111 = vector.broadcast %cst_127 : f32 to vector<8x288xf32>
    %112 = arith.mulf %111, %108 : vector<8x288xf32>
    %113 = arith.select %110, %108, %112 : vector<8x288xi1>, vector<8x288xf32>
    %c0_128 = arith.constant 0 : index
    %c19_129 = arith.constant 19 : index
    %114 = vector.load %arg8[%c0_128, %c19_129] : memref<8x384xf32, #tpu.memory_space<vmem>>, vector<8x288xf32>
    %115 = arith.addf %113, %114 : vector<8x288xf32>
    %c0_130 = arith.constant 0 : index
    %c19_131 = arith.constant 19 : index
    %116 = vector.load %arg9[%c0_130, %c19_131] : memref<8x384xf32, #tpu.memory_space<vmem>>, vector<8x288xf32>
    %117 = arith.addf %115, %116 : vector<8x288xf32>
    %c0_132 = arith.constant 0 : index
    %c0_133 = arith.constant 0 : index
    %c19_134 = arith.constant 19 : index
    %118 = vector.load %arg1[%c0_132, %c0_133, %c19_134] : memref<1x8x384xf32, #tpu.memory_space<vmem>>, vector<1x8x288xf32>
    %119 = vector.shape_cast %118 : vector<1x8x288xf32> to vector<8x288xf32>
    %120 = arith.addf %117, %119 : vector<8x288xf32>
    %c0_135 = arith.constant 0 : index
    %c0_136 = arith.constant 0 : index
    %c0_137 = arith.constant 0 : index
    %121 = vector.load %arg7[%c0_135, %c0_136, %c0_137] : memref<1x8x288xf32, #tpu.memory_space<vmem>>, vector<1x8x288xf32>
    %122 = vector.shape_cast %121 : vector<1x8x288xf32> to vector<8x288xf32>
    %123 = vector.shape_cast %120 : vector<8x288xf32> to vector<1x8x288xf32>
    tpu.vector_store %arg7[%c0_135, %c0_136, %c0_137], %123 {strides = array<i32>} : memref<1x8x288xf32, #tpu.memory_space<vmem>>, vector<1x8x288xf32>,
    return
  }
  func.func @transform_0(%arg0: i32) -> (i32, i32, i32) {
    %c0_i32 = arith.constant 0 : i32
    %c0_i32_0 = arith.constant 0 : i32
    %c0_i32_1 = arith.constant 0 : i32
    return %arg0, %c0_i32, %c0_i32_0 : i32, i32, i32
  }
  func.func @transform_1(%arg0: i32) -> (i32, i32) {
    %c0_i32 = arith.constant 0 : i32
    %c0_i32_0 = arith.constant 0 : i32
    %c0_i32_1 = arith.constant 0 : i32
    return %c0_i32, %c0_i32_0 : i32, i32
  }
  func.func @transform_2(%arg0: i32) -> (i32, i32) {
    %c0_i32 = arith.constant 0 : i32
    %c0_i32_0 = arith.constant 0 : i32
    %c0_i32_1 = arith.constant 0 : i32
    return %c0_i32, %c0_i32_0 : i32, i32
  }
  func.func @transform_3(%arg0: i32) -> (i32, i32) {
    %c0_i32 = arith.constant 0 : i32
    %c0_i32_0 = arith.constant 0 : i32
    %c0_i32_1 = arith.constant 0 : i32
    return %c0_i32, %c0_i32_0 : i32, i32
  }
  func.func @transform_4(%arg0: i32) -> (i32, i32, i32) {
    %c0_i32 = arith.constant 0 : i32
    %c0_i32_0 = arith.constant 0 : i32
    %c0_i32_1 = arith.constant 0 : i32
    %c0_i32_2 = arith.constant 0 : i32
    return %c0_i32, %c0_i32_0, %c0_i32_1 : i32, i32, i32
  }
  func.func @transform_5(%arg0: i32) -> (i32, i32) {
    %c0_i32 = arith.constant 0 : i32
    %c0_i32_0 = arith.constant 0 : i32
    %c0_i32_1 = arith.constant 0 : i32
    return %c0_i32, %c0_i32_0 : i32, i32
  }
  func.func @transform_6(%arg0: i32) -> (i32, i32, i32) {
    %c0_i32 = arith.constant 0 : i32
    %c0_i32_0 = arith.constant 0 : i32
    %c0_i32_1 = arith.constant 0 : i32
    return %arg0, %c0_i32, %c0_i32_0 : i32, i32, i32
  }
}

</mosaic_0001>

<bundles_post_ra>
// kernel: dense_block.1
= control target key start
LH: loop header
LB: loop body
LE: loop exit
PB: predicated region body
PF: predicated region fallthrough
CT: control target
= control target key end

     0   :  { %s1555_s21 = smov 0   ;;  %s2132_s0 = inlined_call_operand.vmem [shape: f32[2,8,384], index: 0, kind: input, shape index: {}]   ;;  %s2133_s1 = inlined_call_operand.vmem [shape: f32[8,72], index: 1, kind: input, shape index: {}]   ;;  %s2134_s2 = inlined_call_operand.vmem [shape: f32[8,144], index: 2, kind: input, shape index: {}]   ;;  %s2135_s3 = inlined_call_operand.vmem [shape: f32[8,216], index: 3, kind: input, shape index: {}]   ;;  %s2136_s4 = inlined_call_operand.vmem [shape: f32[3,8,1], index: 4, kind: input, shape index: {}]   ;;  %s2137_s5 = inlined_call_operand.vmem [shape: f32[1,288], index: 5, kind: input, shape index: {}]   ;;  %s2138_s6 = inlined_call_operand.vmem [shape: f32[2,8,288], index: 6, kind: output, shape index: {}]  }
   0x1 LB: > { %s1459_s22 = sadd.s32 4294967295, %s1507_s21   ;;  %p1463_p0 = scmp.ge.s32.totalorder %s1507_s21, 1  ;;  %s1507_s21 = sphi %s1555_s21, %s16_s21  }
   0x2   : > { %p212_p1 = scmp.lt.s32.totalorder %s1507_s21, 3 }
   0x4   : > { %p213_p2 = pnand %p1463_p0, %p212_p1 }
   0x5   : > { %p242_p3 = scmp.lt.s32.totalorder (!%p213_p2), %s1459_s22, 1  ;;  %s1509_s27 = smov (!%p213_p2), 90  }
   0x6   : > { %216 = sbr.rel (%p213_p2) target bundleno = 1220 (0x4c4), region = 44  ;;  %s1510_s28 = smov (!%p213_p2), 91  }
   0x7   : > { %s1511_s29 = smov (!%p213_p2), 92   ;;  %s1512_s30 = smov (!%p213_p2), 108  }
   0x8   : > { %s1513_s7 = smov (!%p213_p2), 109   ;;  %s1514_s8 = smov (!%p213_p2), 110  }
   0x9   : > { %s1515_s9 = smov (!%p213_p2), 126   ;;  %s1516_s10 = smov (!%p213_p2), 127  }
   0xa   : > { %s1518_s17 = smov (!%p213_p2), 19  }
   0xb   : > { %s2140_s22 = smov (!%p242_p3, %s1459_s22), 1  ;;  %vm258_vm0 = vcmask 261120   ;;  %vm398_vm1 = vcmask 744448   ;;  %vm419_vm2 = vcmask 736256   ;;  %vm377_vm3 = vcmask 752640   ;;  %v456_v32 = vld [vmem:[%s2136_s4] sm:$0xff] }
   0xc   : > { %s1479_s23 = smul.u32 24, %s2140_s22  ;;  %vm356_vm4 = vcmask 883712   ;;  %vm335_vm5 = vcmask 891904   ;;  %v1517_v33 = vmov 0   ;;  %vm314_vm6 = vcmask 900096   ;;  %v428_v46 = vld [vmem:[%s2133_s1] sm:$0xff] }
   0xd   : > { %1499 = vset.pattern.permute.xlu0 %v1517_v33  ;;  %1500 = vset.pattern.permute.xlu2 %v1517_v33  ;;  %vm462_vm7 = vcmask 588800   ;;  %vm293_vm8 = vcmask 1031168   ;;  %vm272_vm9 = vcmask 1039360   ;;  %v1734_v61 = vld [vmem:[%s2137_s5] sm:$0x7]  ;;  %vm545_vm13 = vcmask 154624  }
   0xe   : > { %s1571_s26 = scalar_lea.vmem %s2132_s0, %s1479_s23  ;;  %v537_v63 = vperm.slane %v1734_v61, 1  ;;  %vm547_vm14 = vcmask 1047960   ;;  %vm563_vm15 = vcmask 1047704  }
   0xf   : > { %v409_v0 = vld [vmem:[%s1571_s26 + $0x10] sm:$0xff]  ;;  %v1575_v1 = vld [vmem:[%s1571_s26] sm:$0xff]  ;;  %v1578_v2 = vld [vmem:[%s1571_s26 + $0x8] sm:$0xff] }
  0x10   : > { %417 = vrot.lane.b32.xlu1 %v409_v0, %s1509_s27  ;;  %413 = vrot.lane.b32.xlu0 %v1575_v1, %s1509_s27  ;;  %259 = vst.msk [vmem:[#allocation4 + $0x10] sm:$0xff] %vm258_vm0, %v409_v0 }
  0x11   : > { %394 = vrot.lane.b32.xlu2 %v1578_v2, %s1510_s28 }
  0x17   : > { %v1703_v45 = vld [vmem:[#allocation4 + $0x10] sm:$0xff] }
  0x18   : > { %415 = vrot.lane.b32.xlu0 %v1578_v2, %s1509_s27  ;;  %392 = vrot.lane.b32.xlu1 %v1575_v1, %s1510_s28 }
  0x19   : > { %396 = vrot.lane.b32.xlu2 %v409_v0, %s1510_s28 }
  0x20   : > { %373 = vrot.lane.b32.xlu1 %v1578_v2, %s1511_s29  ;;  %371 = vrot.lane.b32.xlu0 %v1575_v1, %s1511_s29 }
  0x21   : > { %375 = vrot.lane.b32.xlu2 %v409_v0, %s1511_s29 }
  0x28   : > { %352 = vrot.lane.b32.xlu1 %v1578_v2, %s1512_s30  ;;  %350 = vrot.lane.b32.xlu0 %v1575_v1, %s1512_s30 }
  0x29   : > { %354 = vrot.lane.b32.xlu2 %v409_v0, %s1512_s30 }
  0x30   : > { %331 = vrot.lane.b32.xlu1 %v1578_v2, %s1513_s7  ;;  %329 = vrot.lane.b32.xlu0 %v1575_v1, %s1513_s7 }
  0x31   : > { %333 = vrot.lane.b32.xlu2 %v409_v0, %s1513_s7 }
  0x38   : > { %310 = vrot.lane.b32.xlu1 %v1578_v2, %s1514_s8  ;;  %308 = vrot.lane.b32.xlu0 %v1575_v1, %s1514_s8 }
  0x39   : > { %312 = vrot.lane.b32.xlu2 %v409_v0, %s1514_s8 }
  0x40   : > { %289 = vrot.lane.b32.xlu1 %v1578_v2, %s1515_s9  ;;  %287 = vrot.lane.b32.xlu0 %v1575_v1, %s1515_s9 }
  0x41   : > { %291 = vrot.lane.b32.xlu2 %v409_v0, %s1515_s9 }
  0x48   : > { %268 = vrot.lane.b32.xlu1 %v1578_v2, %s1516_s10  ;;  %266 = vrot.lane.b32.xlu0 %v1575_v1, %s1516_s10 }
  0x49   : > { %270 = vrot.lane.b32.xlu2 %v409_v0, %s1516_s10  ;;  %v536_v0 = vperm.slane %v1734_v61, 0 }
  0x50   : > { %459 = vperm.xlu0 %1499, %v456_v32  }
  0x6b   : > { %v395_v3 = vpop.permute.xlu2 %394 }
  0x73   : > { %v397_v4 = vpop.permute.xlu2 %396 }
  0x74   : > { %v1622_v5 = vsel %vm398_vm1, %v395_v3, %v397_v4  ;;  %406 = vst.msk [vmem:[#allocation4 + $0xb8] sm:$0xff] %vm258_vm0, %v397_v4 }
  0x7b   : > { %v376_v6 = vpop.permute.xlu2 %375  ;;  %v1630_v13 = vld [vmem:[#allocation4 + $0xb8] sm:$0xff] }
  0x7c   : > { %385 = vst.msk [vmem:[#allocation4 + $0xa0] sm:$0xff] %vm258_vm0, %v376_v6 }
  0x82   : > { %v418_v7 = vpop.permute.xlu1 %417  ;;  %v414_v8 = vpop.permute.xlu0 %413 }
  0x83   : > { %427 = vst.msk [vmem:[#allocation4 + $0xd0] sm:$0xff] %vm258_vm0, %v418_v7  ;;  %v355_v9 = vpop.permute.xlu2 %354  ;;  %v1644_v18 = vld [vmem:[#allocation4 + $0xa0] sm:$0xff] }
  0x84   : > { %364 = vst.msk [vmem:[#allocation4 + $0x88] sm:$0xff] %vm258_vm0, %v355_v9 }
  0x8a   : > { %v416_v10 = vpop.permute.xlu0 %415  ;;  %v393_v11 = vpop.permute.xlu1 %392  ;;  %v1628_v12 = vld [vmem:[#allocation4 + $0xd0] sm:$0xff] }
  0x8b   : > { %v1633_v14 = vsel %vm419_vm2, %v414_v8, %v416_v10  ;;  %v1636_v15 = vsel %vm419_vm2, %v416_v10, %v418_v7  ;;  %v1639_v16 = vsel %vm398_vm1, %v393_v11, %v395_v3  ;;  %513 = vmatpush.msra.mxu2 %v1628_v12  ;;  %v334_v17 = vpop.permute.xlu2 %333  ;;  %v1649_v19 = vld [vmem:[#allocation4 + $0x88] sm:$0xff]  ;;  %v538_v11 = vperm.slane %v1734_v61, 2 }
  0x8c   : > { %473 = vmatpush.msra.mxu0 %v1633_v14  ;;  %493 = vmatpush.msra.mxu1 %v1636_v15  ;;  %343 = vst.msk [vmem:[#allocation4 + $0x70] sm:$0xff] %vm258_vm0, %v334_v17 }
  0x8d   : > { %514 = vmatpush.msra.mxu2 %v1630_v13 }
  0x8e   : > { %474 = vmatpush.msra.mxu0 %v1639_v16  ;;  %494 = vmatpush.msra.mxu1 %v1622_v5 }
  0x8f   : > { %515 = vmatpush.msra.mxu2 %v1644_v18 }
  0x91   : > { %516 = vmatpush.msra.mxu2 %v1649_v19 }
  0x92   : > { %v374_v20 = vpop.permute.xlu1 %373  ;;  %v372_v21 = vpop.permute.xlu0 %371 }
  0x93   : > { %v1655_v22 = vsel %vm377_vm3, %v374_v20, %v376_v6  ;;  %v1658_v23 = vsel %vm377_vm3, %v372_v21, %v374_v20  ;;  %v313_v24 = vpop.permute.xlu2 %312  ;;  %v1663_v25 = vld [vmem:[#allocation4 + $0x70] sm:$0xff]  ;;  %v1519_v21 = vmov 0.0  }
  0x94   : > { %475 = vmatpush.msra.mxu0 %v1658_v23  ;;  %495 = vmatpush.msra.mxu1 %v1655_v22  ;;  %322 = vst.msk [vmem:[#allocation4 + $0x58] sm:$0xff] %vm258_vm0, %v313_v24 }
  0x95   : > { %517 = vmatpush.msra.mxu2 %v1663_v25  ;;  %546 = vst.msk [vmem:[#allocation2] sm:$0xff] %vm545_vm13, %v1519_v21 }
  0x96   : > { %933 = vst.msk [vmem:[#allocation3] sm:$0xff] %vm545_vm13, %v1519_v21 }
  0x97   : > { %548 = vst.msk [vmem:[#allocation2 + $0x10] sm:$0xff] %vm547_vm14, %v1519_v21 }
  0x98   : > { %934 = vst.msk [vmem:[#allocation3 + $0x10] sm:$0xff] %vm547_vm14, %v1519_v21 }
  0x9a   : > { %v353_v26 = vpop.permute.xlu1 %352  ;;  %v351_v27 = vpop.permute.xlu0 %350 }
  0x9b   : > { %v1667_v28 = vsel %vm356_vm4, %v353_v26, %v355_v9  ;;  %v1670_v29 = vsel %vm356_vm4, %v351_v27, %v353_v26  ;;  %v292_v30 = vpop.permute.xlu2 %291  ;;  %v1674_v31 = vld [vmem:[#allocation4 + $0x58] sm:$0xff] }
  0x9c   : > { %476 = vmatpush.msra.mxu0 %v1670_v29  ;;  %496 = vmatpush.msra.mxu1 %v1667_v28  ;;  %301 = vst.msk [vmem:[#allocation4 + $0x40] sm:$0xff] %vm258_vm0, %v292_v30 }
  0x9d   : > { %518 = vmatpush.msra.mxu2 %v1674_v31 }
  0xa2   : > { %v332_v34 = vpop.permute.xlu1 %331  ;;  %v330_v35 = vpop.permute.xlu0 %329 }
  0xa3   : > { %v1682_v36 = vsel %vm335_vm5, %v332_v34, %v334_v17  ;;  %v1685_v37 = vsel %vm335_vm5, %v330_v35, %v332_v34  ;;  %v271_v38 = vpop.permute.xlu2 %270  ;;  %v1689_v39 = vld [vmem:[#allocation4 + $0x40] sm:$0xff] }
  0xa4   : > { %477 = vmatpush.msra.mxu0 %v1685_v37  ;;  %497 = vmatpush.msra.mxu1 %v1682_v36  ;;  %280 = vst.msk [vmem:[#allocation4 + $0x28] sm:$0xff] %vm258_vm0, %v271_v38 }
  0xa5   : > { %519 = vmatpush.msra.mxu2 %v1689_v39 }
  0xaa   : > { %v311_v40 = vpop.permute.xlu1 %310  ;;  %v309_v41 = vpop.permute.xlu0 %308 }
  0xab   : > { %v1694_v42 = vsel %vm314_vm6, %v311_v40, %v313_v24  ;;  %v1697_v43 = vsel %vm314_vm6, %v309_v41, %v311_v40  ;;  %v1701_v44 = vld [vmem:[#allocation4 + $0x28] sm:$0xff] }
  0xac   : > { %478 = vmatpush.msra.mxu0 %v1697_v43  ;;  %498 = vmatpush.msra.mxu1 %v1694_v42 }
  0xad   : > { %520 = vmatpush.msra.mxu2 %v1701_v44 }
  0xaf   : > { %521 = vmatpush.msra.mxu2 %v1703_v45 }
  0xb0   : > { %1468 = vmatmul.msk.f32.vlgmr.msra.gmra.mxu2 %vm462_vm7, %v428_v46 }
  0xb2   : > { %v290_v47 = vpop.permute.xlu1 %289  ;;  %v288_v48 = vpop.permute.xlu0 %287 }
  0xb3   : > { %v1712_v49 = vsel %vm293_vm8, %v290_v47, %v292_v30  ;;  %v1715_v50 = vsel %vm293_vm8, %v288_v48, %v290_v47 }
  0xb4   : > { %479 = vmatpush.msra.mxu0 %v1715_v50  ;;  %499 = vmatpush.msra.mxu1 %v1712_v49 }
  0xba   : > { %v269_v51 = vpop.permute.xlu1 %268  ;;  %v267_v52 = vpop.permute.xlu0 %266 }
  0xbb   : > { %v1720_v53 = vsel %vm272_vm9, %v269_v51, %v271_v38  ;;  %v1723_v54 = vsel %vm272_vm9, %v267_v52, %v269_v51 }
  0xbc   : > { %480 = vmatpush.msra.mxu0 %v1723_v54  ;;  %500 = vmatpush.msra.mxu1 %v1720_v53 }
  0xbe   : > { %481 = vmatpush.msra.mxu0 %v1575_v1  ;;  %501 = vmatpush.msra.mxu1 %v1578_v2 }
  0xbf   : > { %1466 = vmatmul.msk.f32.vlgmr.msra.gmra.mxu0 %vm462_vm7, %v428_v46  ;;  %1467 = vmatmul.msk.f32.vlgmr.msra.gmra.mxu1 %vm462_vm7, %v428_v46  ;;  %vm566_vm7 = vcmask 416768  }
  0xc2   : > { %v460_v55 = vpop.permute.xlu0 %459 }
 0x133   : > { %v523_v56 = vpop.f32.mrf.mxu2 }
 0x134   : > { %v524_v62 = vadd.f32 %v523_v56, %v460_v55 }
 0x136   : > { %v531_v10 = vmul.f32 0.01, %v524_v62  ;;  %vm528_vm12 = vcmp.ge.f32.partialorder %v524_v62, 0.0 }
 0x138   : > { %v534_v17 = vsel %vm528_vm12, %v524_v62, %v531_v10 }
 0x139   : > { %v544_v20 = vmul.f32 %v538_v11, %v534_v17 }
 0x13c   : > { %v483_v57 = vpop.f32.mrf.mxu0  ;;  %v503_v58 = vpop.f32.mrf.mxu1 }
 0x13d   : > { %v484_v59 = vadd.f32 %v483_v57, %v460_v55  ;;  %v504_v60 = vadd.f32 %v503_v58, %v460_v55 }
 0x13f   : > { %vm526_vm10 = vcmp.ge.f32.partialorder %v484_v59, 0.0  ;;  %v529_v3 = vmul.f32 0.01, %v484_v59  ;;  %vm527_vm11 = vcmp.ge.f32.partialorder %v504_v60, 0.0  ;;  %v530_v4 = vmul.f32 0.01, %v504_v60 }
 0x141   : > { %v533_v6 = vsel %vm527_vm11, %v504_v60, %v530_v4  ;;  %v532_v7 = vsel %vm526_vm10, %v484_v59, %v529_v3  ;;  %vm797_vm10 = vcmask 130048  }
 0x142   : > { %v543_v8 = vmul.f32 %v537_v63, %v533_v6  ;;  %v542_v9 = vmul.f32 %v536_v0, %v532_v7 }
 0x144   : > { %554 = vrot.lane.b32.xlu2 %v543_v8, %s1518_s17  ;;  %552 = vrot.lane.b32.xlu1 %v542_v9, %s1518_s17 }
 0x14c   : > { %556 = vrot.lane.b32.xlu1 %v544_v20, %s1518_s17 }
 0x19e   : > { %v555_v24 = vpop.permute.xlu2 %554 }
 0x1b6   : > { %v553_v26 = vpop.permute.xlu1 %552 }
 0x1b7   : > { %v1751_v27 = vsel %vm545_vm13, %v553_v26, %v555_v24  ;;  %564 = vst.msk [vmem:[#allocation2] sm:$0xff] %vm563_vm15, %v553_v26 }
 0x1be   : > { %v557_v30 = vpop.permute.xlu1 %556  ;;  %v1754_v32 = vld [vmem:[#allocation2] sm:$0xff] }
 0x1bf   : > { %v559_v33 = vsel %vm545_vm13, %v555_v24, %v557_v30  ;;  %680 = vrot.lane.b32.xlu2 %v1754_v32, %s1511_s29  ;;  %660 = vrot.lane.b32.xlu1 %v1754_v32, %s1512_s30 }
 0x1c0   : > { %567 = vst.msk [vmem:[#allocation2 + $0x10] sm:$0xff] %vm566_vm7, %v559_v33  ;;  %640 = vrot.lane.b32.xlu0 %v1754_v32, %s1513_s7 }
 0x1c7   : > { %620 = vrot.lane.b32.xlu2 %v1754_v32, %s1514_s8  ;;  %642 = vrot.lane.b32.xlu1 %v1751_v27, %s1513_s7  ;;  %v1768_v34 = vld [vmem:[#allocation2 + $0x10] sm:$0xff] }
 0x1c8   : > { %682 = vrot.lane.b32.xlu0 %v1751_v27, %s1511_s29  ;;  %573 = vst.msk [vmem:[#allocation4 + $0xe8] sm:$0xff] %vm258_vm0, %v1768_v34 }
 0x1cf   : > { %600 = vrot.lane.b32.xlu2 %v1754_v32, %s1515_s9  ;;  %684 = vrot.lane.b32.xlu1 %v1768_v34, %s1511_s29 }
 0x1d0   : > { %622 = vrot.lane.b32.xlu0 %v1751_v27, %s1514_s8 }
 0x1d7   : > { %580 = vrot.lane.b32.xlu2 %v1754_v32, %s1516_s10  ;;  %664 = vrot.lane.b32.xlu1 %v1768_v34, %s1512_s30 }
 0x1d8   : > { %602 = vrot.lane.b32.xlu0 %v1751_v27, %s1515_s9 }
 0x1df   : > { %662 = vrot.lane.b32.xlu2 %v1751_v27, %s1512_s30  ;;  %644 = vrot.lane.b32.xlu1 %v1768_v34, %s1513_s7 }
 0x1e0   : > { %582 = vrot.lane.b32.xlu0 %v1751_v27, %s1516_s10 }
 0x1e7   : > { %624 = vrot.lane.b32.xlu2 %v1768_v34, %s1514_s8  ;;  %584 = vrot.lane.b32.xlu1 %v1768_v34, %s1516_s10 }
 0x1e8   : > { %604 = vrot.lane.b32.xlu0 %v1768_v34, %s1515_s9 }
 0x1ef   : > { %720 = vrot.lane.b32.xlu2 %v1754_v32, %s1509_s27  ;;  %700 = vrot.lane.b32.xlu1 %v1754_v32, %s1510_s28 }
 0x1f0   : > { %722 = vrot.lane.b32.xlu0 %v1751_v27, %s1509_s27 }
 0x1f7   : > { %702 = vrot.lane.b32.xlu2 %v1751_v27, %s1510_s28  ;;  %704 = vrot.lane.b32.xlu1 %v1768_v34, %s1510_s28 }
 0x1f8   : > { %724 = vrot.lane.b32.xlu0 %v1768_v34, %s1509_s27 }
 0x219   : > { %v681_v35 = vpop.permute.xlu2 %680 }
 0x221   : > { %v621_v38 = vpop.permute.xlu2 %620 }
 0x229   : > { %v601_v40 = vpop.permute.xlu2 %600 }
 0x231   : > { %v581_v41 = vpop.permute.xlu2 %580  ;;  %v661_v46 = vpop.permute.xlu1 %660 }
 0x232   : > { %v641_v47 = vpop.permute.xlu0 %640 }
 0x239   : > { %v663_v48 = vpop.permute.xlu2 %662  ;;  %v643_v51 = vpop.permute.xlu1 %642 }
 0x23a   : > { %v683_v52 = vpop.permute.xlu0 %682  ;;  %v1811_v55 = vsel %vm356_vm4, %v661_v46, %v663_v48  ;;  %v1814_v56 = vsel %vm335_vm5, %v641_v47, %v643_v51 }
 0x23b   : > { %v1817_v57 = vsel %vm377_vm3, %v681_v35, %v683_v52 }
 0x23c   : > { %801 = vmatpush.msra.mxu3 %v1817_v57 }
 0x23e   : > { %802 = vmatpush.msra.mxu3 %v1811_v55 }
 0x240   : > { %803 = vmatpush.msra.mxu3 %v1814_v56 }
 0x241   : > { %v625_v58 = vpop.permute.xlu2 %624  ;;  %v685_v59 = vpop.permute.xlu1 %684 }
 0x242   : > { %v623_v60 = vpop.permute.xlu0 %622  ;;  %633 = vst.msk [vmem:[#allocation4 + $0x130] sm:$0xff] %vm258_vm0, %v625_v58  ;;  %v1824_v62 = vsel %vm377_vm3, %v683_v52, %v685_v59 }
 0x243   : > { %v1827_v3 = vsel %vm314_vm6, %v621_v38, %v623_v60  ;;  %v1830_v4 = vsel %vm314_vm6, %v623_v60, %v625_v58  ;;  %841 = vmatpush.msrb.mxu1 %v1824_v62  ;;  %693 = vst.msk [vmem:[#allocation4 + $0x178] sm:$0xff] %vm258_vm0, %v685_v59 }
 0x244   : > { %804 = vmatpush.msra.mxu3 %v1827_v3 }
 0x249   : > { %v665_v6 = vpop.permute.xlu1 %664  ;;  %v721_v30 = vpop.permute.xlu2 %720  ;;  %v1874_v46 = vld [vmem:[#allocation4 + $0x130] sm:$0xff] }
 0x24a   : > { %v603_v7 = vpop.permute.xlu0 %602  ;;  %v1836_v8 = vsel %vm356_vm4, %v663_v48, %v665_v6  ;;  %673 = vst.msk [vmem:[#allocation4 + $0x160] sm:$0xff] %vm258_vm0, %v665_v6  ;;  %v1844_v10 = vld [vmem:[#allocation4 + $0x178] sm:$0xff] }
 0x24b   : > { %v1840_v9 = vsel %vm293_vm8, %v601_v40, %v603_v7  ;;  %842 = vmatpush.msrb.mxu1 %v1836_v8  ;;  %881 = vmatpush.msrb.mxu0 %v1844_v10  ;;  %v735_v6 = vld [vmem:[%s2134_s2 + $0x8] sm:$0xff] }
 0x24c   : > { %805 = vmatpush.msra.mxu3 %v1840_v9 }
 0x251   : > { %v645_v17 = vpop.permute.xlu1 %644  ;;  %v1847_v20 = vld [vmem:[#allocation4 + $0x160] sm:$0xff]  ;;  %v703_v47 = vpop.permute.xlu2 %702 }
 0x252   : > { %v583_v21 = vpop.permute.xlu0 %582  ;;  %v1850_v24 = vsel %vm335_vm5, %v643_v51, %v645_v17  ;;  %653 = vst.msk [vmem:[#allocation4 + $0x148] sm:$0xff] %vm258_vm0, %v645_v17  ;;  %882 = vmatpush.msrb.mxu0 %v1847_v20  ;;  %v734_v17 = vld [vmem:[%s2134_s2] sm:$0xff] }
 0x253   : > { %v1855_v26 = vsel %vm272_vm9, %v581_v41, %v583_v21  ;;  %843 = vmatpush.msrb.mxu1 %v1850_v24 }
 0x254   : > { %806 = vmatpush.msra.mxu3 %v1855_v26 }
 0x255   : > { %844 = vmatpush.msrb.mxu1 %v1830_v4 }
 0x256   : > { %807 = vmatpush.msra.mxu3 %v1754_v32 }
 0x258   : > { %808 = vmatpush.msra.mxu3 %v1633_v14 }
 0x259   : > { %v585_v33 = vpop.permute.xlu1 %584  ;;  %v1862_v35 = vld [vmem:[#allocation4 + $0x148] sm:$0xff] }
 0x25a   : > { %v605_v38 = vpop.permute.xlu0 %604  ;;  %v1865_v40 = vsel %vm272_vm9, %v583_v21, %v585_v33  ;;  %593 = vst.msk [vmem:[#allocation4 + $0x100] sm:$0xff] %vm258_vm0, %v585_v33  ;;  %883 = vmatpush.msrb.mxu0 %v1862_v35  ;;  %809 = vmatpush.msra.mxu3 %v1639_v16 }
 0x25b   : > { %v1871_v41 = vsel %vm293_vm8, %v603_v7, %v605_v38  ;;  %613 = vst.msk [vmem:[#allocation4 + $0x118] sm:$0xff] %vm258_vm0, %v605_v38  ;;  %v1903_v7 = vld [vmem:[#allocation4 + $0xe8] sm:$0xff] }
 0x25c   : > { %884 = vmatpush.msrb.mxu0 %v1874_v46  ;;  %810 = vmatpush.msra.mxu3 %v1658_v23 }
 0x25d   : > { %845 = vmatpush.msrb.mxu1 %v1871_v41 }
 0x25e   : > { %811 = vmatpush.msra.mxu3 %v1670_v29 }
 0x25f   : > { %846 = vmatpush.msrb.mxu1 %v1865_v40 }
 0x260   : > { %812 = vmatpush.msra.mxu3 %v1685_v37 }
 0x261   : > { %v701_v48 = vpop.permute.xlu1 %700  ;;  %847 = vmatpush.msrb.mxu1 %v1751_v27  ;;  %v1894_v60 = vld [vmem:[#allocation4 + $0x100] sm:$0xff] }
 0x262   : > { %v723_v51 = vpop.permute.xlu0 %722  ;;  %v1884_v52 = vsel %vm398_vm1, %v701_v48, %v703_v47  ;;  %v1886_v58 = vld [vmem:[#allocation4 + $0x118] sm:$0xff]  ;;  %813 = vmatpush.msra.mxu3 %v1697_v43 }
 0x263   : > { %v1890_v59 = vsel %vm419_vm2, %v721_v30, %v723_v51  ;;  %885 = vmatpush.msrb.mxu0 %v1886_v58  ;;  %848 = vmatpush.msrb.mxu1 %v1636_v15 }
 0x264   : > { %814 = vmatpush.msra.mxu3 %v1715_v50  ;;  %835 = vmatpush.msrb.mxu2 %v1890_v59 }
 0x265   : > { %886 = vmatpush.msrb.mxu0 %v1894_v60  ;;  %849 = vmatpush.msrb.mxu1 %v1622_v5 }
 0x266   : > { %815 = vmatpush.msra.mxu3 %v1723_v54  ;;  %836 = vmatpush.msrb.mxu2 %v1884_v52 }
 0x267   : > { %887 = vmatpush.msrb.mxu0 %v1903_v7  ;;  %850 = vmatpush.msrb.mxu1 %v1655_v22 }
 0x268   : > { %1470 = vmatmul.msk.f32.vlgmr.msrb.gmra.mxu2 %vm797_vm10, %v735_v6  ;;  %816 = vmatpush.msra.mxu3 %v1575_v1 }
 0x269   : > { %888 = vmatpush.msrb.mxu0 %v1628_v12  ;;  %v705_v21 = vpop.permute.xlu1 %704  ;;  %851 = vmatpush.msrb.mxu1 %v1667_v28 }
 0x26a   : > { %v725_v30 = vpop.permute.xlu0 %724  ;;  %v1917_v33 = vsel %vm398_vm1, %v703_v47, %v705_v21  ;;  %713 = vst.msk [vmem:[#allocation4 + $0x190] sm:$0xff] %vm258_vm0, %v705_v21  ;;  %817 = vmatmul.f32.vlgmr.msra.gmra.mxu3 %v734_v17 }
 0x26b   : > { %v1921_v38 = vsel %vm419_vm2, %v723_v51, %v725_v30  ;;  %733 = vst.msk [vmem:[#allocation4 + $0x1a8] sm:$0xff] %vm258_vm0, %v725_v30  ;;  %889 = vmatpush.msrb.mxu0 %v1630_v13  ;;  %1212 = vmatpush.msrb.mxu3 %v1817_v57 }
 0x26c   : > { %852 = vmatpush.msrb.mxu1 %v1682_v36  ;;  %875 = vmatpush.msra.mxu2 %v1921_v38 }
 0x26d   : > { %890 = vmatpush.msrb.mxu0 %v1644_v18  ;;  %1213 = vmatpush.msrb.mxu3 %v1811_v55 }
 0x26e   : > { %853 = vmatpush.msrb.mxu1 %v1694_v42  ;;  %876 = vmatpush.msra.mxu2 %v1917_v33 }
 0x26f   : > { %891 = vmatpush.msrb.mxu0 %v1649_v19  ;;  %1214 = vmatpush.msrb.mxu3 %v1814_v56  ;;  %v1469_v56 = vld [vmem:[%s2136_s4 + $0x8] sm:$0xff] }
 0x270   : > { %854 = vmatpush.msrb.mxu1 %v1712_v49  ;;  %1471 = vmatmul.msk.f32.vlgmr.msra.gmra.mxu2 %vm797_vm10, %v735_v6 }
 0x271   : > { %892 = vmatpush.msrb.mxu0 %v1663_v25  ;;  %1215 = vmatpush.msrb.mxu3 %v1827_v3  ;;  %v1943_v55 = vld [vmem:[#allocation4 + $0x190] sm:$0xff] }
 0x272   : > { %v1938_v57 = vld [vmem:[#allocation4 + $0x1a8] sm:$0xff]  ;;  %855 = vmatpush.msrb.mxu1 %v1720_v53  ;;  %794 = vperm.xlu2 %1500, %v1469_v56  }
 0x273   : > { %893 = vmatpush.msrb.mxu0 %v1674_v31  ;;  %915 = vmatpush.msrb.mxu2 %v1938_v57 }
 0x274   : > { %1216 = vmatpush.msrb.mxu3 %v1840_v9  ;;  %856 = vmatpush.msrb.mxu1 %v1578_v2 }
 0x275   : > { %894 = vmatpush.msrb.mxu0 %v1689_v39  ;;  %916 = vmatpush.msrb.mxu2 %v1943_v55 }
 0x276   : > { %857 = vmatmul.f32.vlgmr.msrb.gmra.mxu1 %v734_v17  ;;  %1217 = vmatpush.msrb.mxu3 %v1855_v26 }
 0x277   : > { %895 = vmatpush.msrb.mxu0 %v1701_v44  ;;  %1252 = vmatpush.msra.mxu1 %v1824_v62 }
 0x278   : > { %1218 = vmatpush.msrb.mxu3 %v1754_v32  ;;  %1472 = vmatmul.msk.f32.vlgmr.msrb.gmra.mxu2 %vm797_vm10, %v735_v6 }
 0x279   : > { %896 = vmatpush.msrb.mxu0 %v1703_v45  ;;  %1253 = vmatpush.msra.mxu1 %v1836_v8 }
 0x27a   : > { %897 = vmatmul.f32.vlgmr.msrb.gmra.mxu0 %v734_v17  ;;  %1219 = vmatpush.msrb.mxu3 %v1633_v14 }
 0x27b   : > { %1292 = vmatpush.msra.mxu0 %v1844_v10  ;;  %1254 = vmatpush.msra.mxu1 %v1850_v24 }
 0x27c   : > { %1220 = vmatpush.msrb.mxu3 %v1639_v16 }
 0x27d   : > { %1293 = vmatpush.msra.mxu0 %v1847_v20  ;;  %1255 = vmatpush.msra.mxu1 %v1830_v4 }
 0x27e   : > { %1221 = vmatpush.msrb.mxu3 %v1658_v23 }
 0x27f   : > { %1294 = vmatpush.msra.mxu0 %v1862_v35  ;;  %1256 = vmatpush.msra.mxu1 %v1871_v41 }
 0x280   : > { %1222 = vmatpush.msrb.mxu3 %v1670_v29 }
 0x281   : > { %1295 = vmatpush.msra.mxu0 %v1874_v46  ;;  %1257 = vmatpush.msra.mxu1 %v1865_v40 }
 0x282   : > { %1223 = vmatpush.msrb.mxu3 %v1685_v37 }
 0x283   : > { %1296 = vmatpush.msra.mxu0 %v1886_v58  ;;  %1258 = vmatpush.msra.mxu1 %v1751_v27 }
 0x284   : > { %1224 = vmatpush.msrb.mxu3 %v1697_v43 }
 0x285   : > { %1297 = vmatpush.msra.mxu0 %v1894_v60  ;;  %1259 = vmatpush.msra.mxu1 %v1636_v15 }
 0x286   : > { %1225 = vmatpush.msrb.mxu3 %v1715_v50 }
 0x287   : > { %1298 = vmatpush.msra.mxu0 %v1903_v7  ;;  %1260 = vmatpush.msra.mxu1 %v1622_v5 }
 0x288   : > { %1226 = vmatpush.msrb.mxu3 %v1723_v54 }
 0x289   : > { %1299 = vmatpush.msra.mxu0 %v1628_v12  ;;  %1261 = vmatpush.msra.mxu1 %v1655_v22 }
 0x28a   : > { %1227 = vmatpush.msrb.mxu3 %v1575_v1 }
 0x28b   : > { %1300 = vmatpush.msra.mxu0 %v1630_v13  ;;  %1262 = vmatpush.msra.mxu1 %v1667_v28 }
 0x28d   : > { %1301 = vmatpush.msra.mxu0 %v1644_v18  ;;  %1263 = vmatpush.msra.mxu1 %v1682_v36 }
 0x28f   : > { %1302 = vmatpush.msra.mxu0 %v1649_v19  ;;  %1264 = vmatpush.msra.mxu1 %v1694_v42 }
 0x291   : > { %1303 = vmatpush.msra.mxu0 %v1663_v25  ;;  %1265 = vmatpush.msra.mxu1 %v1712_v49 }
 0x293   : > { %1304 = vmatpush.msra.mxu0 %v1674_v31  ;;  %1266 = vmatpush.msra.mxu1 %v1720_v53 }
 0x295   : > { %1305 = vmatpush.msra.mxu0 %v1689_v39  ;;  %1267 = vmatpush.msra.mxu1 %v1578_v2 }
 0x297   : > { %1306 = vmatpush.msra.mxu0 %v1701_v44 }
 0x299   : > { %1307 = vmatpush.msra.mxu0 %v1703_v45 }
 0x2cc   : > { %v795_v5 = vpop.permute.xlu2 %794 }
 0x2eb   : > { %v838_v1 = vpop.f32.mrf.mxu2 }
 0x2ed   : > { %v818_v12 = vpop.f32.mrf.mxu3 }
 0x2ee   : > { %v819_v13 = vadd.f32 %v818_v12, %v795_v5 }
 0x2f0   : > { %v839_v14 = vadd.f32 %v838_v1, %v819_v13 }
 0x2f2   : > { %vm921_vm11 = vcmp.ge.f32.partialorder %v839_v14, 0.0  ;;  %v924_v15 = vmul.f32 0.01, %v839_v14 }
 0x2f3   : > { %v858_v16 = vpop.f32.mrf.mxu1  ;;  %v878_v18 = vpop.f32.mrf.mxu2 }
 0x2f4   : > { %v859_v19 = vadd.f32 %v858_v16, %v795_v5  ;;  %v927_v22 = vsel %vm921_vm11, %v839_v14, %v924_v15 }
 0x2f5   : > { %v930_v23 = vmul.f32 %v927_v22, %v536_v0  ;;  %v1118_v0 = vld [vmem:[%s2135_s3] sm:$0xff] }
 0x2f6   : > { %v879_v25 = vadd.f32 %v878_v18, %v859_v19  ;;  %1228 = vmatmul.f32.vlgmr.msrb.gmra.mxu3 %v1118_v0  ;;  %1268 = vmatmul.f32.vlgmr.msra.gmra.mxu1 %v1118_v0 }
 0x2f7   : > { %v898_v2 = vpop.f32.mrf.mxu0  ;;  %938 = vrot.lane.b32.xlu0 %v930_v23, %s1518_s17  ;;  %1308 = vmatmul.f32.vlgmr.msra.gmra.mxu0 %v1118_v0 }
 0x2f8   : > { %v899_v28 = vadd.f32 %v898_v2, %v795_v5  ;;  %vm922_vm12 = vcmp.ge.f32.partialorder %v879_v25, 0.0  ;;  %v925_v29 = vmul.f32 0.01, %v879_v25  ;;  %v1383_v2 = vld [vmem:[%s1571_s26 + $0x10] sm:$0xff] }
 0x2fa   : > { %v928_v31 = vsel %vm922_vm12, %v879_v25, %v925_v29  ;;  %v1381_v25 = vld [vmem:[%s1571_s26] sm:$0xff] }
 0x2fb   : > { %v918_v36 = vpop.f32.mrf.mxu2  ;;  %v931_v37 = vmul.f32 %v928_v31, %v537_v63  ;;  %v1119_v31 = vld [vmem:[%s2135_s3 + $0x8] sm:$0xff] }
 0x2fc   : > { %v919_v39 = vadd.f32 %v918_v36, %v899_v28  ;;  %v1382_v28 = vld [vmem:[%s1571_s26 + $0x8] sm:$0xff] }
 0x2fd   : > { %940 = vrot.lane.b32.xlu1 %v931_v37, %s1518_s17 }
 0x2fe   : > { %vm923_vm14 = vcmp.ge.f32.partialorder %v919_v39, 0.0  ;;  %v926_v42 = vmul.f32 0.01, %v919_v39 }
 0x300   : > { %v929_v43 = vsel %vm923_vm14, %v919_v39, %v926_v42 }
 0x301   : > { %v932_v44 = vmul.f32 %v929_v43, %v538_v11  ;;  %v1473_v11 = vld [vmem:[%s2136_s4 + $0x10] sm:$0xff] }
 0x303   : > { %942 = vrot.lane.b32.xlu2 %v932_v44, %s1518_s17 }
 0x35d   : > { %v943_v49 = vpop.permute.xlu2 %942 }
 0x369   : > { %v939_v45 = vpop.permute.xlu0 %938 }
 0x36a   : > { %949 = vst.msk [vmem:[#allocation3] sm:$0xff] %vm563_vm15, %v939_v45 }
 0x36f   : > { %v941_v50 = vpop.permute.xlu1 %940 }
 0x370   : > { %v2009_v53 = vsel %vm545_vm13, %v939_v45, %v941_v50  ;;  %v945_v54 = vsel %vm545_vm13, %v941_v50, %v943_v49 }
 0x371   : > { %v2012_v63 = vld [vmem:[#allocation3] sm:$0xff]  ;;  %951 = vst.msk [vmem:[#allocation3 + $0x10] sm:$0xff] %vm566_vm7, %v945_v54 }
 0x372   : > { %1104 = vrot.lane.b32.xlu0 %v2012_v63, %s1509_s27  ;;  %1084 = vrot.lane.b32.xlu2 %v2012_v63, %s1510_s28 }
 0x373   : > { %1064 = vrot.lane.b32.xlu1 %v2012_v63, %s1511_s29 }
 0x378   : > { %v1100_v61 = vld [vmem:[#allocation3 + $0x10] sm:$0xff] }
 0x379   : > { %957 = vst.msk [vmem:[#allocation4 + $0x1c0] sm:$0xff] %vm258_vm0, %v1100_v61 }
 0x37a   : > { %1044 = vrot.lane.b32.xlu0 %v2012_v63, %s1512_s30  ;;  %1024 = vrot.lane.b32.xlu2 %v2012_v63, %s1513_s7 }
 0x37b   : > { %1108 = vrot.lane.b32.xlu1 %v1100_v61, %s1509_s27 }
 0x380   : > { %v1176_v49 = vld [vmem:[#allocation4 + $0x1c0] sm:$0xff] }
 0x382   : > { %1004 = vrot.lane.b32.xlu2 %v2012_v63, %s1514_s8  ;;  %1086 = vrot.lane.b32.xlu0 %v2009_v53, %s1510_s28 }
 0x383   : > { %1088 = vrot.lane.b32.xlu1 %v1100_v61, %s1510_s28 }
 0x38a   : > { %984 = vrot.lane.b32.xlu2 %v2012_v63, %s1515_s9  ;;  %1026 = vrot.lane.b32.xlu0 %v2009_v53, %s1513_s7 }
 0x38b   : > { %1068 = vrot.lane.b32.xlu1 %v1100_v61, %s1511_s29 }
 0x392   : > { %1066 = vrot.lane.b32.xlu2 %v2009_v53, %s1511_s29  ;;  %1006 = vrot.lane.b32.xlu0 %v2009_v53, %s1514_s8 }
 0x393   : > { %1106 = vrot.lane.b32.xlu1 %v2009_v53, %s1509_s27 }
 0x39a   : > { %964 = vrot.lane.b32.xlu2 %v2012_v63, %s1516_s10  ;;  %986 = vrot.lane.b32.xlu0 %v2009_v53, %s1515_s9 }
 0x39b   : > { %1046 = vrot.lane.b32.xlu1 %v2009_v53, %s1512_s30 }
 0x3a2   : > { %1028 = vrot.lane.b32.xlu2 %v1100_v61, %s1513_s7  ;;  %966 = vrot.lane.b32.xlu0 %v2009_v53, %s1516_s10 }
 0x3a3   : > { %1048 = vrot.lane.b32.xlu1 %v1100_v61, %s1512_s30 }
 0x3aa   : > { %968 = vrot.lane.b32.xlu2 %v1100_v61, %s1516_s10  ;;  %1008 = vrot.lane.b32.xlu0 %v1100_v61, %s1514_s8  ;;  %s251_s8 = scalar_lea.vmem %s2138_s6, %s1479_s23 }
 0x3ab   : > { %988 = vrot.lane.b32.xlu1 %v1100_v61, %s1515_s9 }
 0x3b2   : > { %1349 = vrot.lane.b32.xlu2 %v1751_v27, %s1513_s7  ;;  %1205 = vperm.xlu0 %1499, %v1473_v11  }
 0x3b3   : > { %1347 = vrot.lane.b32.xlu1 %v1754_v32, %s1513_s7 }
 0x3ba   : > { %1369 = vrot.lane.b32.xlu2 %v2009_v53, %s1513_s7  ;;  %1351 = vrot.lane.b32.xlu0 %v1768_v34, %s1513_s7 }
 0x3bb   : > { %1367 = vrot.lane.b32.xlu1 %v2012_v63, %s1513_s7 }
 0x3c2   : > { %1371 = vrot.lane.b32.xlu0 %v1100_v61, %s1513_s7  ;;  %1389 = vrot.lane.b32.xlu2 %v1382_v28, %s1513_s7  ;;  %v1229_v61 = vpop.f32.mrf.mxu3 }
 0x3c3   : > { %1387 = vrot.lane.b32.xlu1 %v1381_v25, %s1513_s7 }
 0x3ca   : > { %1391 = vrot.lane.b32.xlu0 %v1383_v2, %s1513_s7 }
 0x3cc   : > { %v1085_v62 = vpop.permute.xlu2 %1084 }
 0x3d4   : > { %v1025_v3 = vpop.permute.xlu2 %1024 }
 0x3dc   : > { %v1005_v4 = vpop.permute.xlu2 %1004 }
 0x3e4   : > { %v1105_v8 = vpop.permute.xlu0 %1104  ;;  %v985_v27 = vpop.permute.xlu2 %984 }
 0x3e5   : > { %v1065_v9 = vpop.permute.xlu1 %1064 }
 0x3ec   : > { %v1045_v10 = vpop.permute.xlu0 %1044  ;;  %v1067_v20 = vpop.permute.xlu2 %1066 }
 0x3ed   : > { %v1070_v32 = vsel %vm377_vm3, %v1065_v9, %v1067_v20  ;;  %v1109_v24 = vpop.permute.xlu1 %1108 }
 0x3ee   : > { %1117 = vst.msk [vmem:[#allocation4 + $0x280] sm:$0xff] %vm258_vm0, %v1109_v24 }
 0x3f4   : > { %v1087_v26 = vpop.permute.xlu0 %1086  ;;  %v965_v34 = vpop.permute.xlu2 %964 }
 0x3f5   : > { %v1090_v35 = vsel %vm398_vm1, %v1085_v62, %v1087_v26  ;;  %v1089_v40 = vpop.permute.xlu1 %1088  ;;  %v1200_v46 = vld [vmem:[#allocation4 + $0x280] sm:$0xff] }
 0x3f6   : > { %v1091_v41 = vsel %vm398_vm1, %v1087_v26, %v1089_v40  ;;  %1317 = vmatpush.msra.mxu3 %v1200_v46  ;;  %1097 = vst.msk [vmem:[#allocation4 + $0x268] sm:$0xff] %vm258_vm0, %v1089_v40  ;;  %vm1208_vm1 = vcmask 719872   ;;  %v1269_v26 = vpop.f32.mrf.mxu1 }
 0x3fc   : > { %v1029_v47 = vpop.permute.xlu2 %1028  ;;  %v1027_v48 = vpop.permute.xlu0 %1026 }
 0x3fd   : > { %1037 = vst.msk [vmem:[#allocation4 + $0x220] sm:$0xff] %vm258_vm0, %v1029_v47  ;;  %v1030_v51 = vsel %vm335_vm5, %v1025_v3, %v1027_v48  ;;  %v1031_v58 = vsel %vm335_vm5, %v1027_v48, %v1029_v47  ;;  %v1069_v60 = vpop.permute.xlu1 %1068  ;;  %v1197_v7 = vld [vmem:[#allocation4 + $0x268] sm:$0xff] }
 0x3fe   : > { %v1071_v6 = vsel %vm377_vm3, %v1067_v20, %v1069_v60  ;;  %1318 = vmatpush.msra.mxu3 %v1197_v7  ;;  %1077 = vst.msk [vmem:[#allocation4 + $0x250] sm:$0xff] %vm258_vm0, %v1069_v60 }
 0x404   : > { %v969_v17 = vpop.permute.xlu2 %968  ;;  %v1007_v21 = vpop.permute.xlu0 %1006  ;;  %v1188_v43 = vld [vmem:[#allocation4 + $0x220] sm:$0xff] }
 0x405   : > { %977 = vst.msk [vmem:[#allocation4 + $0x1d8] sm:$0xff] %vm258_vm0, %v969_v17  ;;  %v1010_v30 = vsel %vm314_vm6, %v1005_v4, %v1007_v21  ;;  %v1107_v56 = vpop.permute.xlu1 %1106  ;;  %v1194_v12 = vld [vmem:[#allocation4 + $0x250] sm:$0xff] }
 0x406   : > { %v1110_v1 = vsel %vm419_vm2, %v1105_v8, %v1107_v56  ;;  %v1111_v5 = vsel %vm419_vm2, %v1107_v56, %v1109_v24  ;;  %1319 = vmatpush.msra.mxu3 %v1194_v12  ;;  %v1309_v24 = vpop.f32.mrf.mxu0 }
 0x407   : > { %1237 = vmatpush.msra.mxu2 %v1110_v1 }
 0x409   : > { %1238 = vmatpush.msra.mxu2 %v1090_v35 }
 0x40b   : > { %1239 = vmatpush.msra.mxu2 %v1070_v32 }
 0x40c   : > { %v987_v13 = vpop.permute.xlu0 %986  ;;  %v1350_v50 = vpop.permute.xlu2 %1349 }
 0x40d   : > { %v990_v14 = vsel %vm293_vm8, %v985_v27, %v987_v13  ;;  %v1047_v15 = vpop.permute.xlu1 %1046 }
 0x40e   : > { %v1050_v16 = vsel %vm356_vm4, %v1045_v10, %v1047_v15 }
 0x40f   : > { %1240 = vmatpush.msra.mxu2 %v1050_v16 }
 0x411   : > { %1241 = vmatpush.msra.mxu2 %v1030_v51 }
 0x413   : > { %1242 = vmatpush.msra.mxu2 %v1010_v30 }
 0x414   : > { %v967_v18 = vpop.permute.xlu0 %966 }
 0x415   : > { %v970_v19 = vsel %vm272_vm9, %v965_v34, %v967_v18  ;;  %v971_v22 = vsel %vm272_vm9, %v967_v18, %v969_v17  ;;  %v1049_v23 = vpop.permute.xlu1 %1048  ;;  %1243 = vmatpush.msra.mxu2 %v990_v14 }
 0x416   : > { %v1051_v29 = vsel %vm356_vm4, %v1047_v15, %v1049_v23  ;;  %1057 = vst.msk [vmem:[#allocation4 + $0x238] sm:$0xff] %vm258_vm0, %v1049_v23 }
 0x417   : > { %1244 = vmatpush.msra.mxu2 %v970_v19 }
 0x419   : > { %1245 = vmatpush.msra.mxu2 %v2012_v63  ;;  %v1370_v63 = vpop.permute.xlu2 %1369 }
 0x41b   : > { %1246 = vmatpush.msra.mxu2 %v1890_v59 }
 0x41c   : > { %v1009_v36 = vpop.permute.xlu0 %1008 }
 0x41d   : > { %v1011_v37 = vsel %vm314_vm6, %v1007_v21, %v1009_v36  ;;  %1017 = vst.msk [vmem:[#allocation4 + $0x208] sm:$0xff] %vm258_vm0, %v1009_v36  ;;  %v989_v39 = vpop.permute.xlu1 %988  ;;  %1247 = vmatpush.msra.mxu2 %v1884_v52  ;;  %v1191_v59 = vld [vmem:[#allocation4 + $0x238] sm:$0xff] }
 0x41e   : > { %v991_v42 = vsel %vm293_vm8, %v987_v13, %v989_v39  ;;  %1474 = vmatmul.msk.f32.vlgmr.msra.gmra.mxu2 %vm1208_vm1, %v1119_v31  ;;  %997 = vst.msk [vmem:[#allocation4 + $0x1f0] sm:$0xff] %vm258_vm0, %v989_v39  ;;  %1320 = vmatpush.msra.mxu3 %v1191_v59  ;;  %v1179_v52 = vld [vmem:[#allocation4 + $0x1d8] sm:$0xff] }
 0x41f   : > { %1277 = vmatpush.msrb.mxu2 %v1111_v5 }
 0x420   : > { %1321 = vmatpush.msra.mxu3 %v1188_v43 }
 0x421   : > { %1278 = vmatpush.msrb.mxu2 %v1091_v41  ;;  %v1390_v3 = vpop.permute.xlu2 %1389 }
 0x423   : > { %1279 = vmatpush.msrb.mxu2 %v1071_v6 }
 0x424   : > { %v1185_v44 = vld [vmem:[#allocation4 + $0x208] sm:$0xff]  ;;  %v1206_v0 = vpop.permute.xlu0 %1205 }
 0x425   : > { %1322 = vmatpush.msra.mxu3 %v1185_v44  ;;  %1280 = vmatpush.msrb.mxu2 %v1051_v29  ;;  %v1182_v45 = vld [vmem:[#allocation4 + $0x1f0] sm:$0xff]  ;;  %v1348_v54 = vpop.permute.xlu1 %1347  ;;  %v1310_v35 = vadd.f32 %v1309_v24, %v1206_v0  ;;  %v1270_v46 = vadd.f32 %v1269_v26, %v1206_v0 }
 0x427   : > { %1281 = vmatpush.msrb.mxu2 %v1031_v58  ;;  %1323 = vmatpush.msra.mxu3 %v1182_v45 }
 0x429   : > { %1282 = vmatpush.msrb.mxu2 %v1011_v37  ;;  %1324 = vmatpush.msra.mxu3 %v1179_v52 }
 0x42b   : > { %1283 = vmatpush.msrb.mxu2 %v991_v42  ;;  %1325 = vmatpush.msra.mxu3 %v1176_v49 }
 0x42c   : > { %v1352_v10 = vpop.permute.xlu0 %1351 }
 0x42d   : > { %1284 = vmatpush.msrb.mxu2 %v971_v22  ;;  %1326 = vmatpush.msra.mxu3 %v1938_v57  ;;  %v1368_v11 = vpop.permute.xlu1 %1367  ;;  %v1230_v57 = vadd.f32 %v1229_v61, %v1206_v0  ;;  %v1354_v17 = vsel %vm335_vm5, %v1350_v50, %v1352_v10 }
 0x42e   : > { %v1373_v27 = vsel %vm335_vm5, %v1368_v11, %v1370_v63 }
 0x42f   : > { %1285 = vmatpush.msrb.mxu2 %v2009_v53  ;;  %1327 = vmatpush.msra.mxu3 %v1943_v55 }
 0x430   : > { %1476 = vmatmul.msk.f32.vlgmr.msra.gmra.mxu3 %vm1208_vm1, %v1119_v31 }
 0x431   : > { %1286 = vmatpush.msrb.mxu2 %v1921_v38  ;;  %v1353_v38 = vsel %vm335_vm5, %v1348_v54, %v1350_v50 }
 0x433   : > { %1287 = vmatpush.msrb.mxu2 %v1917_v33 }
 0x434   : > { %1475 = vmatmul.msk.f32.vlgmr.msrb.gmra.mxu2 %vm1208_vm1, %v1119_v31  ;;  %v1372_v34 = vpop.permute.xlu0 %1371 }
 0x435   : > { %v1388_v4 = vpop.permute.xlu1 %1387  ;;  %v1374_v1 = vsel %vm335_vm5, %v1370_v63, %v1372_v34 }
 0x436   : > { %v1393_v9 = vsel %vm335_vm5, %v1388_v4, %v1390_v3 }
 0x43c   : > { %v1392_v7 = vpop.permute.xlu0 %1391 }
 0x43d   : > { %v1394_v5 = vsel %vm335_vm5, %v1390_v3, %v1392_v7 }
 0x4a1   : > { %v1249_v62 = vpop.f32.mrf.mxu2 }
 0x4a2   : > { %v1250_v53 = vadd.f32 %v1249_v62, %v1230_v57 }
 0x4a4   : > { %vm1332_vm2 = vcmp.ge.f32.partialorder %v1250_v53, 0.0  ;;  %v1335_v55 = vmul.f32 0.01, %v1250_v53 }
 0x4a6   : > { %v1338_v8 = vsel %vm1332_vm2, %v1250_v53, %v1335_v55 }
 0x4a7   : > { %v1358_v33 = vadd.f32 %v1353_v38, %v1338_v8 }
 0x4a9   : > { %v1378_v20 = vadd.f32 %v1373_v27, %v1358_v33 }
 0x4ab   : > { %v1398_v32 = vadd.f32 %v1393_v9, %v1378_v20 }
 0x4ad   : > { %1401 = vst [vmem:[%s251_s8] sm:$0xff] %v1398_v32 }
 0x4b3   : > { %v1329_v40 = vpop.f32.mrf.mxu3 }
 0x4b4   : > { %v1330_v41 = vadd.f32 %v1329_v40, %v1310_v35 }
 0x4b6   : > { %vm1334_vm3 = vcmp.ge.f32.partialorder %v1330_v41, 0.0  ;;  %v1337_v47 = vmul.f32 0.01, %v1330_v41 }
 0x4b7   : > { %v1289_v48 = vpop.f32.mrf.mxu2 }
 0x4b8   : > { %v1290_v51 = vadd.f32 %v1289_v48, %v1270_v46  ;;  %v1340_v58 = vsel %vm1334_vm3, %v1330_v41, %v1337_v47 }
 0x4b9   : > { %v1360_v60 = vadd.f32 %v1352_v10, %v1340_v58 }
 0x4ba   : > { %vm1333_vm4 = vcmp.ge.f32.partialorder %v1290_v51, 0.0  ;;  %v1336_v6 = vmul.f32 0.01, %v1290_v51 }
 0x4bb   : > { %v1380_v21 = vadd.f32 %v1372_v34, %v1360_v60 }
 0x4bc   : > { %v1339_v30 = vsel %vm1333_vm4, %v1290_v51, %v1336_v6 }
 0x4bd   : > { %v1359_v56 = vadd.f32 %v1354_v17, %v1339_v30  ;;  %v1400_v12 = vadd.f32 %v1392_v7, %v1380_v21 }
 0x4bf   : > { %v1379_v13 = vadd.f32 %v1374_v1, %v1359_v56  ;;  %1403 = vst.msk [vmem:[%s251_s8 + $0x10] sm:$0xff] %vm258_vm0, %v1400_v12 }
 0x4c1   : > { %v1399_v14 = vadd.f32 %v1394_v5, %v1379_v13 }
 0x4c3   : > { %1402 = vst [vmem:[%s251_s8 + $0x8] sm:$0xff] %v1399_v14 }
 0x4c4 PF: > { %s16_s21 = sadd.s32 1, %s1507_s21  }
 0x4c5   : > { %p13_p4 = scmp.ge.s32.totalorder %s16_s21, 4  }
 0x4c7   :  { %15 = sbr.rel (!%p13_p4) target bundleno = 1 (0x1), region = 76 }

</bundles_post_ra>
